<compile_context>
chip_gen: v6e
topology: v6e:2x2x1
jax: 0.10.0
libtpu: 0.0.40
codegen_flags: <defaults>
</compile_context>

<pallas_src>
import functools

import jax
import jax.numpy as jnp
from jax import lax
from jax.experimental import pallas as pl
from jax.experimental.pallas import tpu as pltpu


def _round_up(n, m):
    return ((n + m - 1) // m) * m


def _pack_rows(mats, lanes):
    """Stack 2-D f32 arrays into one (R, lanes) array. Each block starts at an
    8-aligned sublane offset and occupies lanes [0, cols); the rest is zero.
    Returns (packed, per-block row offsets)."""
    blocks, offsets, row = [], [], 0
    for m in mats:
        m = jnp.asarray(m, jnp.float32)
        r, c = m.shape
        assert c <= lanes
        rp = _round_up(r, 8)
        blk = jnp.zeros((rp, lanes), jnp.float32).at[:r, :c].set(m)
        blocks.append(blk)
        offsets.append(row)
        row += rp
    return jnp.concatenate(blocks, axis=0), tuple(offsets)


def prepare_params(params, n_train):
    """One-time weight prep: transpose/scale/pack all PyTorch-shaped weights
    into a single lane-padded f32 array (one weight DMA per kernel call)."""
    enc_w1t = jnp.asarray(params["enc_w1"], jnp.float32).T      # (n_features, n_hidden)
    enc_b1 = jnp.asarray(params["enc_b1"], jnp.float32).reshape(1, -1)
    enc_w2t = jnp.asarray(params["enc_w2"], jnp.float32).T      # (n_hidden, enc)
    enc_b2 = jnp.asarray(params["enc_b2"], jnp.float32).reshape(1, -1)

    attn_w1 = jnp.asarray(params["attn_w1"], jnp.float32)
    attn_w1s = attn_w1[:, :n_train]                             # (Ha, n_train)
    attn_w1e = attn_w1[:, n_train:]                             # (Ha, enc)
    attn_b1 = jnp.asarray(params["attn_b1"], jnp.float32).reshape(-1, 1)   # (Ha, 1)
    attn_w2c = jnp.asarray(params["attn_w2"], jnp.float32).T    # (Ha, 1) column
    # attn_b2 is dropped: LogSoftmax(dim=0) and argmax are shift-invariant -> no-op.

    n_features, n_hidden = enc_w1t.shape
    enc = enc_w2t.shape[1]
    Ha = attn_w1s.shape[0]
    four_enc = 4 * enc

    # LSTM weights (PyTorch gate order i,f,g,o), packed DENSELY (4*enc lanes):
    #  * rank-1 collapse of the input matmul (x's columns are all identical,
    #    including t=0 where x = ones, so x @ W_ih^T == col * rowsum(W_ih^T)),
    #  * the g-gate block is pre-scaled by 2 so the whole gates vreg can go
    #    through ONE sigmoid; g is recovered as tanh(x) = 2*sigmoid(2x) - 1.
    w_ih_t = jnp.asarray(params["lstm_w_ih"], jnp.float32).T    # (n_antes, 4*enc)
    wih_rowsum = jnp.sum(w_ih_t, axis=0, keepdims=True)         # (1, 4*enc)
    w_hh_t = jnp.asarray(params["lstm_w_hh"], jnp.float32).T    # (enc, 4*enc)
    lstm_b = (jnp.asarray(params["lstm_b_ih"], jnp.float32)
              + jnp.asarray(params["lstm_b_hh"], jnp.float32)).reshape(1, -1)
    g_scale = jnp.concatenate([jnp.ones((enc,), jnp.float32),
                               jnp.ones((enc,), jnp.float32),
                               jnp.full((enc,), 2.0, jnp.float32),
                               jnp.ones((enc,), jnp.float32)]).reshape(1, -1)
    whht = w_hh_t * g_scale
    wih_rs = wih_rowsum * g_scale
    lstm_b = lstm_b * g_scale

    lanes = 128 * pl.cdiv(max(n_hidden, enc, n_train, Ha, four_enc), 128)
    w_pack, offs = _pack_rows(
        [enc_w1t, enc_b1, enc_w2t, enc_b2,
         attn_w1s, attn_w1e, attn_b1, attn_w2c,
         whht, wih_rs, lstm_b], lanes)

    meta = dict(n_features=n_features, n_hidden=n_hidden, enc=enc, Ha=Ha, offs=offs)
    return w_pack, meta


def cen_brl_kernel(context_ref, S_ref, w_ref, d_ref, *,
                   n_features, n_hidden, enc, Ha, n_antes, max_len, offs):
    n_train, Np = S_ref.shape
    four_enc = 4 * enc
    (o_w1, o_b1, o_w2, o_b2,
     o_a1s, o_a1e, o_ab1, o_aw2c,
     o_whh, o_wih, o_lb) = offs

    # ---- hoisted weight loads (each packed slice read once, outside the loop) ----
    enc_w1t = w_ref[pl.ds(o_w1, n_features), :n_hidden]
    enc_b1 = w_ref[pl.ds(o_b1, 1), :n_hidden]
    enc_w2t = w_ref[pl.ds(o_w2, n_hidden), :enc]
    enc_b2 = w_ref[pl.ds(o_b2, 1), :enc]
    attn_w1s = w_ref[pl.ds(o_a1s, Ha), :n_train]
    attn_w1e = w_ref[pl.ds(o_a1e, Ha), :enc]
    attn_b1 = w_ref[pl.ds(o_ab1, Ha), :1]
    attn_w2c = w_ref[pl.ds(o_aw2c, Ha), :1]
    whht = w_ref[pl.ds(o_whh, enc), :four_enc]        # (enc, 4*enc), g-cols pre-scaled
    wih_rs = w_ref[pl.ds(o_wih, 1), :four_enc]        # rank-1 W_ih term
    lstm_b = w_ref[pl.ds(o_lb, 1), :four_enc]

    ctx = context_ref[...]
    S = S_ref[...]                                    # (n_train, Np), zero-padded lanes

    # ---- context encoder: Linear -> ReLU -> Linear (runs once) ----
    hid = jnp.maximum(
        jnp.dot(ctx, enc_w1t, preferred_element_type=jnp.float32) + enc_b1, 0.0)
    phi = jnp.dot(hid, enc_w2t, preferred_element_type=jnp.float32) + enc_b2

    # loop-invariant attention term (lane-dense (Ha, Np) rows) + hoisted broadcasts
    haT_base = jnp.dot(attn_w1s, S, preferred_element_type=jnp.float32) + attn_b1
    wih_rs_b = jnp.broadcast_to(wih_rs, (n_train, four_enc))
    lstm_b_b = jnp.broadcast_to(lstm_b, (n_train, four_enc))
    attn_w2_b = jnp.broadcast_to(attn_w2c, (Ha, Np))
    lane_iota = lax.broadcasted_iota(jnp.int32, (1, Np), 1)
    neg_pad = jnp.where(lane_iota < n_antes, 0.0, -1e30).astype(jnp.float32)
    inv_n = jnp.float32(1.0 / n_train)

    h = phi                                       # LSTM h0 = phi
    c = jnp.zeros((n_train, enc), jnp.float32)    # LSTM c0 = 0
    col = jnp.ones((n_train, 1), jnp.float32)     # x is rank-1: all columns == col

    rows = []
    # max_len is small & static; the data-dependent argmax feedback makes the
    # timestep loop inherently sequential -> unrolled Python loop.
    for t in range(max_len):
        # -- single-step LSTM cell: ONE (n_train,enc)x(enc,4*enc) MXU matmul and
        #    ONE full-width sigmoid; g recovered via tanh(x) = 2*sigmoid(2x) - 1. --
        gates = (col * wih_rs_b
                 + jnp.dot(h, whht, preferred_element_type=jnp.float32)
                 + lstm_b_b)                                       # (n_train, 4*enc)
        sg = jax.nn.sigmoid(gates)
        i_g = sg[:, 0 * enc:1 * enc]
        f_g = sg[:, 1 * enc:2 * enc]
        g_g = 2.0 * sg[:, 2 * enc:3 * enc] - 1.0                   # == tanh(g_pre)
        o_g = sg[:, 3 * enc:4 * enc]
        c = f_g * c + i_g * g_g
        h = o_g * jnp.tanh(c)

        # -- attention e-term, mean-first (no MXU on this serial path):
        #    hbar = mean_i h[i,:]; e_term[a] = <W1e[a,:], hbar> --
        hbar = jnp.sum(h, axis=0, keepdims=True) * inv_n           # (1, enc)
        e_term = jnp.sum(attn_w1e * hbar, axis=1, keepdims=True)   # (Ha, 1)
        haT = jnp.maximum(haT_base + e_term, 0.0)                  # (Ha, Np)
        # scores on VPU/XLU (M=1 matmul kept off the MXU); padded lanes -> -1e30
        scores = jnp.sum(attn_w2_b * haT, axis=0, keepdims=True) + neg_pad  # (1, Np)
        # attn_b2 omitted: log-softmax / argmax are shift-invariant (exact no-op).

        # log-softmax over the antecedent axis (torch LogSoftmax(dim=0));
        # masked lanes contribute exactly 0 to the sum-exp and never win the max.
        m = jnp.max(scores, axis=1, keepdims=True)
        lse = m + jnp.log(jnp.sum(jnp.exp(scores - m), axis=1, keepdims=True))
        rows.append(scores - lse)

        if t + 1 < max_len:
            # next x column: S[:, argmax(scores)]  (first max, matches torch.argmax)
            amax = jnp.min(jnp.where(scores == m, lane_iota, Np),
                           axis=1, keepdims=True)                  # (1, 1)
            onehot = (lane_iota == amax).astype(jnp.float32)       # (1, Np)
            col = jnp.sum(S * onehot, axis=1, keepdims=True)       # (n_train, 1)

    # lane/sublane-dense single store of all timestep rows (wrapper slices back)
    out_rows = d_ref.shape[0]
    if out_rows > max_len:
        rows.append(jnp.zeros((out_rows - max_len, Np), jnp.float32))
    d_ref[...] = jnp.concatenate(rows, axis=0)


def cen_brl_forward(context, S, w_pack, meta, max_len):
    n_train, n_antes = S.shape
    Np = 128 * pl.cdiv(n_antes, 128)
    out_rows = max(8, 8 * pl.cdiv(max_len, 8))

    context = jnp.asarray(context, jnp.float32)
    S_pad = jnp.zeros((n_train, Np), jnp.float32).at[:, :n_antes].set(
        jnp.asarray(S, jnp.float32))

    kernel = functools.partial(
        cen_brl_kernel, max_len=max_len, n_antes=n_antes,
        n_features=meta["n_features"], n_hidden=meta["n_hidden"],
        enc=meta["enc"], Ha=meta["Ha"], offs=meta["offs"])
    vmem = lambda: pl.BlockSpec(memory_space=pltpu.MemorySpace.VMEM)
    # TODO(synk): for batched independent CEN_BRL problems (esp. v7x's 2 TCs) add a
    # leading "parallel" grid axis over problems; for large n_train/n_antes, tile S
    # over n_antes with a grid + online log-softmax and set vmem_limit_bytes.
    d_pad = pl.pallas_call(
        kernel,
        out_shape=jax.ShapeDtypeStruct((out_rows, Np), jnp.float32),
        in_specs=[vmem(), vmem(), vmem()],
        out_specs=vmem(),
    )(context, S_pad, w_pack)
    return d_pad[:max_len, :n_antes]


def _uniform(key, shape, fan_in):
    bound = 1.0 / jnp.sqrt(jnp.float32(fan_in))
    return jax.random.uniform(key, shape, jnp.float32, -bound, bound)


if __name__ == "__main__":
    # small shapes consistent with the module
    n_train, n_features = 8, 16
    n_hidden, encoding_dim = 32, 32
    n_antes = 16                     # len(A)
    attention_hidden = 32
    max_len = 4

    key = jax.random.PRNGKey(0)
    ks = jax.random.split(key, 16)

    params = {
        # context encoder
        "enc_w1": _uniform(ks[0], (n_hidden, n_features), n_features),
        "enc_b1": _uniform(ks[1], (n_hidden,), n_features),
        "enc_w2": _uniform(ks[2], (encoding_dim, n_hidden), n_hidden),
        "enc_b2": _uniform(ks[3], (encoding_dim,), n_hidden),
        # LSTM (num_layers=1), gate order i,f,g,o
        "lstm_w_ih": _uniform(ks[4], (4 * encoding_dim, n_antes), encoding_dim),
        "lstm_w_hh": _uniform(ks[5], (4 * encoding_dim, encoding_dim), encoding_dim),
        "lstm_b_ih": _uniform(ks[6], (4 * encoding_dim,), encoding_dim),
        "lstm_b_hh": _uniform(ks[7], (4 * encoding_dim,), encoding_dim),
        # attention: Linear(n_train+enc -> Ha) -> ReLU -> Linear(Ha -> 1) -> LogSoftmax(dim=0)
        "attn_w1": _uniform(ks[8], (attention_hidden, n_train + encoding_dim),
                            n_train + encoding_dim),
        "attn_b1": _uniform(ks[9], (attention_hidden,), n_train + encoding_dim),
        "attn_w2": _uniform(ks[10], (1, attention_hidden), attention_hidden),
        "attn_b2": _uniform(ks[11], (1,), attention_hidden),   # no-op (shift-invariant)
    }

    context = jax.random.normal(ks[12], (n_train, n_features), jnp.float32)
    S = (jax.random.uniform(ks[13], (n_train, n_antes)) > 0.5).astype(jnp.float32)

    w_pack, meta = prepare_params(params, n_train)
    d = cen_brl_forward(context, S, w_pack, meta, max_len)
    jax.block_until_ready(d)
    assert d.shape == (max_len, n_antes)
    print("KERNEL_OK")
</pallas_src>

<mosaic_0001>
module attributes {stable_mosaic.version = 11 : i64} {
  func.func @cen_brl_kernel(%arg0: memref<8x16xf32, #tpu.memory_space<vmem>>, %arg1: memref<8x128xf32, #tpu.memory_space<vmem>>, %arg2: memref<240x128xf32, #tpu.memory_space<vmem>>, %arg3: memref<8x128xf32, #tpu.memory_space<vmem>>) attributes {dimension_semantics = [], scalar_prefetch = 0 : i64, scratch_operands = 0 : i64, tpu.core_type = #tpu.core_type<tc>} {
    %c0 = arith.constant 0 : index
    %c0_0 = arith.constant 0 : index
    %0 = vector.load %arg2[%c0, %c0_0] : memref<240x128xf32, #tpu.memory_space<vmem>>, vector<16x32xf32>
    %c16 = arith.constant 16 : index
    %c0_1 = arith.constant 0 : index
    %1 = vector.load %arg2[%c16, %c0_1] : memref<240x128xf32, #tpu.memory_space<vmem>>, vector<1x32xf32>
    %c24 = arith.constant 24 : index
    %c0_2 = arith.constant 0 : index
    %2 = vector.load %arg2[%c24, %c0_2] : memref<240x128xf32, #tpu.memory_space<vmem>>, vector<32x32xf32>
    %c56 = arith.constant 56 : index
    %c0_3 = arith.constant 0 : index
    %3 = vector.load %arg2[%c56, %c0_3] : memref<240x128xf32, #tpu.memory_space<vmem>>, vector<1x32xf32>
    %c64 = arith.constant 64 : index
    %c0_4 = arith.constant 0 : index
    %4 = vector.load %arg2[%c64, %c0_4] : memref<240x128xf32, #tpu.memory_space<vmem>>, vector<32x8xf32>
    %c96 = arith.constant 96 : index
    %c0_5 = arith.constant 0 : index
    %5 = vector.load %arg2[%c96, %c0_5] : memref<240x128xf32, #tpu.memory_space<vmem>>, vector<32x32xf32>
    %c128 = arith.constant 128 : index
    %c0_6 = arith.constant 0 : index
    %6 = vector.load %arg2[%c128, %c0_6] : memref<240x128xf32, #tpu.memory_space<vmem>>, vector<32x1xf32>
    %c160 = arith.constant 160 : index
    %c0_7 = arith.constant 0 : index
    %7 = vector.load %arg2[%c160, %c0_7] : memref<240x128xf32, #tpu.memory_space<vmem>>, vector<32x1xf32>
    %c192 = arith.constant 192 : index
    %c0_8 = arith.constant 0 : index
    %8 = vector.load %arg2[%c192, %c0_8] : memref<240x128xf32, #tpu.memory_space<vmem>>, vector<32x128xf32>
    %c224 = arith.constant 224 : index
    %c0_9 = arith.constant 0 : index
    %9 = vector.load %arg2[%c224, %c0_9] : memref<240x128xf32, #tpu.memory_space<vmem>>, vector<1x128xf32>
    %c232 = arith.constant 232 : index
    %c0_10 = arith.constant 0 : index
    %10 = vector.load %arg2[%c232, %c0_10] : memref<240x128xf32, #tpu.memory_space<vmem>>, vector<1x128xf32>
    %c0_11 = arith.constant 0 : index
    %c0_12 = arith.constant 0 : index
    %11 = vector.load %arg0[%c0_11, %c0_12] : memref<8x16xf32, #tpu.memory_space<vmem>>, vector<8x16xf32>
    %c0_13 = arith.constant 0 : index
    %c0_14 = arith.constant 0 : index
    %12 = vector.load %arg1[%c0_13, %c0_14] : memref<8x128xf32, #tpu.memory_space<vmem>>, vector<8x128xf32>
    %cst = arith.constant dense<0.000000e+00> : vector<8x32xf32>
    %13 = tpu.matmul %11, %0, %cst {dimension_numbers = #tpu.dot_dimension_numbers<[1], [0], [0], [1], [0, 0, 1, 1], [], []>} : vector<8x16xf32>, vector<16x32xf32>, vector<8x32xf32> -> vector<8x32xf32>
    %14 = vector.broadcast %1 : vector<1x32xf32> to vector<8x32xf32>
    %15 = arith.addf %13, %14 : vector<8x32xf32>
    %cst_15 = arith.constant 0.000000e+00 : f32
    %16 = vector.broadcast %cst_15 : f32 to vector<8x32xf32>
    %17 = arith.maximumf %15, %16 : vector<8x32xf32>
    %cst_16 = arith.constant dense<0.000000e+00> : vector<8x32xf32>
    %18 = tpu.matmul %17, %2, %cst_16 {dimension_numbers = #tpu.dot_dimension_numbers<[1], [0], [0], [1], [0, 0, 1, 1], [], []>} : vector<8x32xf32>, vector<32x32xf32>, vector<8x32xf32> -> vector<8x32xf32>
    %19 = vector.broadcast %3 : vector<1x32xf32> to vector<8x32xf32>
    %20 = arith.addf %18, %19 : vector<8x32xf32>
    %cst_17 = arith.constant dense<0.000000e+00> : vector<32x128xf32>
    %21 = tpu.matmul %4, %12, %cst_17 {dimension_numbers = #tpu.dot_dimension_numbers<[1], [0], [0], [1], [0, 0, 1, 1], [], []>} : vector<32x8xf32>, vector<8x128xf32>, vector<32x128xf32> -> vector<32x128xf32>
    %22 = vector.broadcast %6 : vector<32x1xf32> to vector<32x128xf32>
    %23 = arith.addf %21, %22 : vector<32x128xf32>
    %24 = vector.shape_cast %9 : vector<1x128xf32> to vector<1x128xf32>
    %25 = vector.broadcast %24 : vector<1x128xf32> to vector<8x128xf32>
    %26 = vector.shape_cast %10 : vector<1x128xf32> to vector<1x128xf32>
    %27 = vector.broadcast %26 : vector<1x128xf32> to vector<8x128xf32>
    %28 = vector.shape_cast %7 : vector<32x1xf32> to vector<32x1xf32>
    %29 = vector.broadcast %28 : vector<32x1xf32> to vector<32x128xf32>
    %30 = tpu.iota {dimensions = array<i32: 1>} : vector<1x128xi32>
    %c16_i32 = arith.constant 16 : i32
    %31 = vector.broadcast %c16_i32 : i32 to vector<1x128xi32>
    %32 = arith.cmpi slt, %30, %31 : vector<1x128xi32>
    %cst_18 = arith.constant 0.000000e+00 : f32
    %cst_19 = arith.constant -1.000000e+30 : f32
    %33 = vector.broadcast %cst_18 : f32 to vector<1x128xf32>
    %34 = vector.broadcast %cst_19 : f32 to vector<1x128xf32>
    %35 = arith.select %32, %33, %34 : vector<1x128xi1>, vector<1x128xf32>
    %cst_20 = arith.constant 0.000000e+00 : f32
    %36 = vector.broadcast %cst_20 : f32 to vector<8x32xf32>
    %cst_21 = arith.constant 1.000000e+00 : f32
    %37 = vector.broadcast %cst_21 : f32 to vector<8x1xf32>
    %38 = vector.broadcast %37 : vector<8x1xf32> to vector<8x128xf32>
    %39 = arith.mulf %38, %25 : vector<8x128xf32>
    %cst_22 = arith.constant dense<0.000000e+00> : vector<8x128xf32>
    %40 = tpu.matmul %20, %8, %cst_22 {dimension_numbers = #tpu.dot_dimension_numbers<[1], [0], [0], [1], [0, 0, 1, 1], [], []>} : vector<8x32xf32>, vector<32x128xf32>, vector<8x128xf32> -> vector<8x128xf32>
    %41 = arith.addf %39, %40 : vector<8x128xf32>
    %42 = arith.addf %41, %27 : vector<8x128xf32>
    %43 = arith.negf %42 : vector<8x128xf32>
    %44 = math.exp %43 : vector<8x128xf32>
    %cst_23 = arith.constant 1.000000e+00 : f32
    %45 = vector.broadcast %cst_23 : f32 to vector<8x128xf32>
    %46 = arith.addf %45, %44 : vector<8x128xf32>
    %47 = arith.divf %45, %46 : vector<8x128xf32>
    %48 = vector.extract_strided_slice %47 {offsets = [0, 0], sizes = [8, 32], strides = [1, 1]} : vector<8x128xf32> to vector<8x32xf32>
    %49 = vector.extract_strided_slice %47 {offsets = [0, 32], sizes = [8, 32], strides = [1, 1]} : vector<8x128xf32> to vector<8x32xf32>
    %50 = vector.extract_strided_slice %47 {offsets = [0, 64], sizes = [8, 32], strides = [1, 1]} : vector<8x128xf32> to vector<8x32xf32>
    %cst_24 = arith.constant 2.000000e+00 : f32
    %51 = vector.broadcast %cst_24 : f32 to vector<8x32xf32>
    %52 = arith.mulf %51, %50 : vector<8x32xf32>
    %cst_25 = arith.constant 1.000000e+00 : f32
    %53 = vector.broadcast %cst_25 : f32 to vector<8x32xf32>
    %54 = arith.subf %52, %53 : vector<8x32xf32>
    %55 = vector.extract_strided_slice %47 {offsets = [0, 96], sizes = [8, 32], strides = [1, 1]} : vector<8x128xf32> to vector<8x32xf32>
    %56 = arith.mulf %49, %36 : vector<8x32xf32>
    %57 = arith.mulf %48, %54 : vector<8x32xf32>
    %58 = arith.addf %56, %57 : vector<8x32xf32>
    %59 = math.tanh %58 : vector<8x32xf32>
    %60 = arith.mulf %55, %59 : vector<8x32xf32>
    %cst_26 = arith.constant dense<0.000000e+00> : vector<32xf32>
    %61 = vector.multi_reduction <add>, %60, %cst_26 [0] : vector<8x32xf32> to vector<32xf32>
    %62 = vector.shape_cast %61 : vector<32xf32> to vector<1x32xf32>
    %cst_27 = arith.constant 1.250000e-01 : f32
    %63 = vector.broadcast %cst_27 : f32 to vector<1x32xf32>
    %64 = arith.mulf %62, %63 : vector<1x32xf32>
    %65 = vector.broadcast %64 : vector<1x32xf32> to vector<32x32xf32>
    %66 = arith.mulf %5, %65 : vector<32x32xf32>
    %cst_28 = arith.constant dense<0.000000e+00> : vector<32xf32>
    %67 = vector.multi_reduction <add>, %66, %cst_28 [1] : vector<32x32xf32> to vector<32xf32>
    %68 = vector.shape_cast %67 : vector<32xf32> to vector<32x1xf32>
    %69 = vector.broadcast %68 : vector<32x1xf32> to vector<32x128xf32>
    %70 = arith.addf %23, %69 : vector<32x128xf32>
    %cst_29 = arith.constant 0.000000e+00 : f32
    %71 = vector.broadcast %cst_29 : f32 to vector<32x128xf32>
    %72 = arith.maximumf %70, %71 : vector<32x128xf32>
    %73 = arith.mulf %29, %72 : vector<32x128xf32>
    %cst_30 = arith.constant dense<0.000000e+00> : vector<128xf32>
    %74 = vector.multi_reduction <add>, %73, %cst_30 [0] : vector<32x128xf32> to vector<128xf32>
    %75 = vector.shape_cast %74 : vector<128xf32> to vector<1x128xf32>
    %76 = arith.addf %75, %35 : vector<1x128xf32>
    %cst_31 = arith.constant dense<0xFF800000> : vector<1xf32>
    %77 = vector.multi_reduction <maximumf>, %76, %cst_31 [1] : vector<1x128xf32> to vector<1xf32>
    %78 = vector.shape_cast %77 : vector<1xf32> to vector<1x1xf32>
    %79 = vector.broadcast %78 : vector<1x1xf32> to vector<1x128xf32>
    %80 = arith.subf %76, %79 : vector<1x128xf32>
    %81 = math.exp %80 : vector<1x128xf32>
    %cst_32 = arith.constant dense<0.000000e+00> : vector<1xf32>
    %82 = vector.multi_reduction <add>, %81, %cst_32 [1] : vector<1x128xf32> to vector<1xf32>
    %83 = vector.shape_cast %82 : vector<1xf32> to vector<1x1xf32>
    %84 = math.log %83 : vector<1x1xf32>
    %85 = arith.addf %78, %84 : vector<1x1xf32>
    %86 = vector.broadcast %85 : vector<1x1xf32> to vector<1x128xf32>
    %87 = arith.subf %76, %86 : vector<1x128xf32>
    %88 = vector.broadcast %78 : vector<1x1xf32> to vector<1x128xf32>
    %89 = arith.cmpf oeq, %76, %88 : vector<1x128xf32>
    %c128_i32 = arith.constant 128 : i32
    %90 = vector.broadcast %c128_i32 : i32 to vector<1x128xi32>
    %91 = arith.select %89, %30, %90 : vector<1x128xi1>, vector<1x128xi32>
    %cst_33 = arith.constant dense<2147483647> : vector<1xi32>
    %92 = vector.multi_reduction <minsi>, %91, %cst_33 [1] : vector<1x128xi32> to vector<1xi32>
    %93 = vector.shape_cast %92 : vector<1xi32> to vector<1x1xi32>
    %94 = vector.broadcast %93 : vector<1x1xi32> to vector<1x128xi32>
    %95 = arith.cmpi eq, %30, %94 : vector<1x128xi32>
    %96 = arith.extui %95 : vector<1x128xi1> to vector<1x128xi32>
    %97 = arith.sitofp %96 : vector<1x128xi32> to vector<1x128xf32>
    %98 = vector.broadcast %97 : vector<1x128xf32> to vector<8x128xf32>
    %99 = arith.mulf %12, %98 : vector<8x128xf32>
    %cst_34 = arith.constant dense<0.000000e+00> : vector<8xf32>
    %100 = vector.multi_reduction <add>, %99, %cst_34 [1] : vector<8x128xf32> to vector<8xf32>
    %101 = vector.shape_cast %100 : vector<8xf32> to vector<8x1xf32>
    %102 = vector.broadcast %101 : vector<8x1xf32> to vector<8x128xf32>
    %103 = arith.mulf %102, %25 : vector<8x128xf32>
    %cst_35 = arith.constant dense<0.000000e+00> : vector<8x128xf32>
    %104 = tpu.matmul %60, %8, %cst_35 {dimension_numbers = #tpu.dot_dimension_numbers<[1], [0], [0], [1], [0, 0, 1, 1], [], []>} : vector<8x32xf32>, vector<32x128xf32>, vector<8x128xf32> -> vector<8x128xf32>
    %105 = arith.addf %103, %104 : vector<8x128xf32>
    %106 = arith.addf %105, %27 : vector<8x128xf32>
    %107 = arith.negf %106 : vector<8x128xf32>
    %108 = math.exp %107 : vector<8x128xf32>
    %cst_36 = arith.constant 1.000000e+00 : f32
    %109 = vector.broadcast %cst_36 : f32 to vector<8x128xf32>
    %110 = arith.addf %109, %108 : vector<8x128xf32>
    %111 = arith.divf %109, %110 : vector<8x128xf32>
    %112 = vector.extract_strided_slice %111 {offsets = [0, 0], sizes = [8, 32], strides = [1, 1]} : vector<8x128xf32> to vector<8x32xf32>
    %113 = vector.extract_strided_slice %111 {offsets = [0, 32], sizes = [8, 32], strides = [1, 1]} : vector<8x128xf32> to vector<8x32xf32>
    %114 = vector.extract_strided_slice %111 {offsets = [0, 64], sizes = [8, 32], strides = [1, 1]} : vector<8x128xf32> to vector<8x32xf32>
    %cst_37 = arith.constant 2.000000e+00 : f32
    %115 = vector.broadcast %cst_37 : f32 to vector<8x32xf32>
    %116 = arith.mulf %115, %114 : vector<8x32xf32>
    %cst_38 = arith.constant 1.000000e+00 : f32
    %117 = vector.broadcast %cst_38 : f32 to vector<8x32xf32>
    %118 = arith.subf %116, %117 : vector<8x32xf32>
    %119 = vector.extract_strided_slice %111 {offsets = [0, 96], sizes = [8, 32], strides = [1, 1]} : vector<8x128xf32> to vector<8x32xf32>
    %120 = arith.mulf %113, %58 : vector<8x32xf32>
    %121 = arith.mulf %112, %118 : vector<8x32xf32>
    %122 = arith.addf %120, %121 : vector<8x32xf32>
    %123 = math.tanh %122 : vector<8x32xf32>
    %124 = arith.mulf %119, %123 : vector<8x32xf32>
    %cst_39 = arith.constant dense<0.000000e+00> : vector<32xf32>
    %125 = vector.multi_reduction <add>, %124, %cst_39 [0] : vector<8x32xf32> to vector<32xf32>
    %126 = vector.shape_cast %125 : vector<32xf32> to vector<1x32xf32>
    %cst_40 = arith.constant 1.250000e-01 : f32
    %127 = vector.broadcast %cst_40 : f32 to vector<1x32xf32>
    %128 = arith.mulf %126, %127 : vector<1x32xf32>
    %129 = vector.broadcast %128 : vector<1x32xf32> to vector<32x32xf32>
    %130 = arith.mulf %5, %129 : vector<32x32xf32>
    %cst_41 = arith.constant dense<0.000000e+00> : vector<32xf32>
    %131 = vector.multi_reduction <add>, %130, %cst_41 [1] : vector<32x32xf32> to vector<32xf32>
    %132 = vector.shape_cast %131 : vector<32xf32> to vector<32x1xf32>
    %133 = vector.broadcast %132 : vector<32x1xf32> to vector<32x128xf32>
    %134 = arith.addf %23, %133 : vector<32x128xf32>
    %cst_42 = arith.constant 0.000000e+00 : f32
    %135 = vector.broadcast %cst_42 : f32 to vector<32x128xf32>
    %136 = arith.maximumf %134, %135 : vector<32x128xf32>
    %137 = arith.mulf %29, %136 : vector<32x128xf32>
    %cst_43 = arith.constant dense<0.000000e+00> : vector<128xf32>
    %138 = vector.multi_reduction <add>, %137, %cst_43 [0] : vector<32x128xf32> to vector<128xf32>
    %139 = vector.shape_cast %138 : vector<128xf32> to vector<1x128xf32>
    %140 = arith.addf %139, %35 : vector<1x128xf32>
    %cst_44 = arith.constant dense<0xFF800000> : vector<1xf32>
    %141 = vector.multi_reduction <maximumf>, %140, %cst_44 [1] : vector<1x128xf32> to vector<1xf32>
    %142 = vector.shape_cast %141 : vector<1xf32> to vector<1x1xf32>
    %143 = vector.broadcast %142 : vector<1x1xf32> to vector<1x128xf32>
    %144 = arith.subf %140, %143 : vector<1x128xf32>
    %145 = math.exp %144 : vector<1x128xf32>
    %cst_45 = arith.constant dense<0.000000e+00> : vector<1xf32>
    %146 = vector.multi_reduction <add>, %145, %cst_45 [1] : vector<1x128xf32> to vector<1xf32>
    %147 = vector.shape_cast %146 : vector<1xf32> to vector<1x1xf32>
    %148 = math.log %147 : vector<1x1xf32>
    %149 = arith.addf %142, %148 : vector<1x1xf32>
    %150 = vector.broadcast %149 : vector<1x1xf32> to vector<1x128xf32>
    %151 = arith.subf %140, %150 : vector<1x128xf32>
    %152 = vector.broadcast %142 : vector<1x1xf32> to vector<1x128xf32>
    %153 = arith.cmpf oeq, %140, %152 : vector<1x128xf32>
    %c128_i32_46 = arith.constant 128 : i32
    %154 = vector.broadcast %c128_i32_46 : i32 to vector<1x128xi32>
    %155 = arith.select %153, %30, %154 : vector<1x128xi1>, vector<1x128xi32>
    %cst_47 = arith.constant dense<2147483647> : vector<1xi32>
    %156 = vector.multi_reduction <minsi>, %155, %cst_47 [1] : vector<1x128xi32> to vector<1xi32>
    %157 = vector.shape_cast %156 : vector<1xi32> to vector<1x1xi32>
    %158 = vector.broadcast %157 : vector<1x1xi32> to vector<1x128xi32>
    %159 = arith.cmpi eq, %30, %158 : vector<1x128xi32>
    %160 = arith.extui %159 : vector<1x128xi1> to vector<1x128xi32>
    %161 = arith.sitofp %160 : vector<1x128xi32> to vector<1x128xf32>
    %162 = vector.broadcast %161 : vector<1x128xf32> to vector<8x128xf32>
    %163 = arith.mulf %12, %162 : vector<8x128xf32>
    %cst_48 = arith.constant dense<0.000000e+00> : vector<8xf32>
    %164 = vector.multi_reduction <add>, %163, %cst_48 [1] : vector<8x128xf32> to vector<8xf32>
    %165 = vector.shape_cast %164 : vector<8xf32> to vector<8x1xf32>
    %166 = vector.broadcast %165 : vector<8x1xf32> to vector<8x128xf32>
    %167 = arith.mulf %166, %25 : vector<8x128xf32>
    %cst_49 = arith.constant dense<0.000000e+00> : vector<8x128xf32>
    %168 = tpu.matmul %124, %8, %cst_49 {dimension_numbers = #tpu.dot_dimension_numbers<[1], [0], [0], [1], [0, 0, 1, 1], [], []>} : vector<8x32xf32>, vector<32x128xf32>, vector<8x128xf32> -> vector<8x128xf32>
    %169 = arith.addf %167, %168 : vector<8x128xf32>
    %170 = arith.addf %169, %27 : vector<8x128xf32>
    %171 = arith.negf %170 : vector<8x128xf32>
    %172 = math.exp %171 : vector<8x128xf32>
    %cst_50 = arith.constant 1.000000e+00 : f32
    %173 = vector.broadcast %cst_50 : f32 to vector<8x128xf32>
    %174 = arith.addf %173, %172 : vector<8x128xf32>
    %175 = arith.divf %173, %174 : vector<8x128xf32>
    %176 = vector.extract_strided_slice %175 {offsets = [0, 0], sizes = [8, 32], strides = [1, 1]} : vector<8x128xf32> to vector<8x32xf32>
    %177 = vector.extract_strided_slice %175 {offsets = [0, 32], sizes = [8, 32], strides = [1, 1]} : vector<8x128xf32> to vector<8x32xf32>
    %178 = vector.extract_strided_slice %175 {offsets = [0, 64], sizes = [8, 32], strides = [1, 1]} : vector<8x128xf32> to vector<8x32xf32>
    %cst_51 = arith.constant 2.000000e+00 : f32
    %179 = vector.broadcast %cst_51 : f32 to vector<8x32xf32>
    %180 = arith.mulf %179, %178 : vector<8x32xf32>
    %cst_52 = arith.constant 1.000000e+00 : f32
    %181 = vector.broadcast %cst_52 : f32 to vector<8x32xf32>
    %182 = arith.subf %180, %181 : vector<8x32xf32>
    %183 = vector.extract_strided_slice %175 {offsets = [0, 96], sizes = [8, 32], strides = [1, 1]} : vector<8x128xf32> to vector<8x32xf32>
    %184 = arith.mulf %177, %122 : vector<8x32xf32>
    %185 = arith.mulf %176, %182 : vector<8x32xf32>
    %186 = arith.addf %184, %185 : vector<8x32xf32>
    %187 = math.tanh %186 : vector<8x32xf32>
    %188 = arith.mulf %183, %187 : vector<8x32xf32>
    %cst_53 = arith.constant dense<0.000000e+00> : vector<32xf32>
    %189 = vector.multi_reduction <add>, %188, %cst_53 [0] : vector<8x32xf32> to vector<32xf32>
    %190 = vector.shape_cast %189 : vector<32xf32> to vector<1x32xf32>
    %cst_54 = arith.constant 1.250000e-01 : f32
    %191 = vector.broadcast %cst_54 : f32 to vector<1x32xf32>
    %192 = arith.mulf %190, %191 : vector<1x32xf32>
    %193 = vector.broadcast %192 : vector<1x32xf32> to vector<32x32xf32>
    %194 = arith.mulf %5, %193 : vector<32x32xf32>
    %cst_55 = arith.constant dense<0.000000e+00> : vector<32xf32>
    %195 = vector.multi_reduction <add>, %194, %cst_55 [1] : vector<32x32xf32> to vector<32xf32>
    %196 = vector.shape_cast %195 : vector<32xf32> to vector<32x1xf32>
    %197 = vector.broadcast %196 : vector<32x1xf32> to vector<32x128xf32>
    %198 = arith.addf %23, %197 : vector<32x128xf32>
    %cst_56 = arith.constant 0.000000e+00 : f32
    %199 = vector.broadcast %cst_56 : f32 to vector<32x128xf32>
    %200 = arith.maximumf %198, %199 : vector<32x128xf32>
    %201 = arith.mulf %29, %200 : vector<32x128xf32>
    %cst_57 = arith.constant dense<0.000000e+00> : vector<128xf32>
    %202 = vector.multi_reduction <add>, %201, %cst_57 [0] : vector<32x128xf32> to vector<128xf32>
    %203 = vector.shape_cast %202 : vector<128xf32> to vector<1x128xf32>
    %204 = arith.addf %203, %35 : vector<1x128xf32>
    %cst_58 = arith.constant dense<0xFF800000> : vector<1xf32>
    %205 = vector.multi_reduction <maximumf>, %204, %cst_58 [1] : vector<1x128xf32> to vector<1xf32>
    %206 = vector.shape_cast %205 : vector<1xf32> to vector<1x1xf32>
    %207 = vector.broadcast %206 : vector<1x1xf32> to vector<1x128xf32>
    %208 = arith.subf %204, %207 : vector<1x128xf32>
    %209 = math.exp %208 : vector<1x128xf32>
    %cst_59 = arith.constant dense<0.000000e+00> : vector<1xf32>
    %210 = vector.multi_reduction <add>, %209, %cst_59 [1] : vector<1x128xf32> to vector<1xf32>
    %211 = vector.shape_cast %210 : vector<1xf32> to vector<1x1xf32>
    %212 = math.log %211 : vector<1x1xf32>
    %213 = arith.addf %206, %212 : vector<1x1xf32>
    %214 = vector.broadcast %213 : vector<1x1xf32> to vector<1x128xf32>
    %215 = arith.subf %204, %214 : vector<1x128xf32>
    %216 = vector.broadcast %206 : vector<1x1xf32> to vector<1x128xf32>
    %217 = arith.cmpf oeq, %204, %216 : vector<1x128xf32>
    %c128_i32_60 = arith.constant 128 : i32
    %218 = vector.broadcast %c128_i32_60 : i32 to vector<1x128xi32>
    %219 = arith.select %217, %30, %218 : vector<1x128xi1>, vector<1x128xi32>
    %cst_61 = arith.constant dense<2147483647> : vector<1xi32>
    %220 = vector.multi_reduction <minsi>, %219, %cst_61 [1] : vector<1x128xi32> to vector<1xi32>
    %221 = vector.shape_cast %220 : vector<1xi32> to vector<1x1xi32>
    %222 = vector.broadcast %221 : vector<1x1xi32> to vector<1x128xi32>
    %223 = arith.cmpi eq, %30, %222 : vector<1x128xi32>
    %224 = arith.extui %223 : vector<1x128xi1> to vector<1x128xi32>
    %225 = arith.sitofp %224 : vector<1x128xi32> to vector<1x128xf32>
    %226 = vector.broadcast %225 : vector<1x128xf32> to vector<8x128xf32>
    %227 = arith.mulf %12, %226 : vector<8x128xf32>
    %cst_62 = arith.constant dense<0.000000e+00> : vector<8xf32>
    %228 = vector.multi_reduction <add>, %227, %cst_62 [1] : vector<8x128xf32> to vector<8xf32>
    %229 = vector.shape_cast %228 : vector<8xf32> to vector<8x1xf32>
    %230 = vector.broadcast %229 : vector<8x1xf32> to vector<8x128xf32>
    %231 = arith.mulf %230, %25 : vector<8x128xf32>
    %cst_63 = arith.constant dense<0.000000e+00> : vector<8x128xf32>
    %232 = tpu.matmul %188, %8, %cst_63 {dimension_numbers = #tpu.dot_dimension_numbers<[1], [0], [0], [1], [0, 0, 1, 1], [], []>} : vector<8x32xf32>, vector<32x128xf32>, vector<8x128xf32> -> vector<8x128xf32>
    %233 = arith.addf %231, %232 : vector<8x128xf32>
    %234 = arith.addf %233, %27 : vector<8x128xf32>
    %235 = arith.negf %234 : vector<8x128xf32>
    %236 = math.exp %235 : vector<8x128xf32>
    %cst_64 = arith.constant 1.000000e+00 : f32
    %237 = vector.broadcast %cst_64 : f32 to vector<8x128xf32>
    %238 = arith.addf %237, %236 : vector<8x128xf32>
    %239 = arith.divf %237, %238 : vector<8x128xf32>
    %240 = vector.extract_strided_slice %239 {offsets = [0, 0], sizes = [8, 32], strides = [1, 1]} : vector<8x128xf32> to vector<8x32xf32>
    %241 = vector.extract_strided_slice %239 {offsets = [0, 32], sizes = [8, 32], strides = [1, 1]} : vector<8x128xf32> to vector<8x32xf32>
    %242 = vector.extract_strided_slice %239 {offsets = [0, 64], sizes = [8, 32], strides = [1, 1]} : vector<8x128xf32> to vector<8x32xf32>
    %cst_65 = arith.constant 2.000000e+00 : f32
    %243 = vector.broadcast %cst_65 : f32 to vector<8x32xf32>
    %244 = arith.mulf %243, %242 : vector<8x32xf32>
    %cst_66 = arith.constant 1.000000e+00 : f32
    %245 = vector.broadcast %cst_66 : f32 to vector<8x32xf32>
    %246 = arith.subf %244, %245 : vector<8x32xf32>
    %247 = vector.extract_strided_slice %239 {offsets = [0, 96], sizes = [8, 32], strides = [1, 1]} : vector<8x128xf32> to vector<8x32xf32>
    %248 = arith.mulf %241, %186 : vector<8x32xf32>
    %249 = arith.mulf %240, %246 : vector<8x32xf32>
    %250 = arith.addf %248, %249 : vector<8x32xf32>
    %251 = math.tanh %250 : vector<8x32xf32>
    %252 = arith.mulf %247, %251 : vector<8x32xf32>
    %cst_67 = arith.constant dense<0.000000e+00> : vector<32xf32>
    %253 = vector.multi_reduction <add>, %252, %cst_67 [0] : vector<8x32xf32> to vector<32xf32>
    %254 = vector.shape_cast %253 : vector<32xf32> to vector<1x32xf32>
    %cst_68 = arith.constant 1.250000e-01 : f32
    %255 = vector.broadcast %cst_68 : f32 to vector<1x32xf32>
    %256 = arith.mulf %254, %255 : vector<1x32xf32>
    %257 = vector.broadcast %256 : vector<1x32xf32> to vector<32x32xf32>
    %258 = arith.mulf %5, %257 : vector<32x32xf32>
    %cst_69 = arith.constant dense<0.000000e+00> : vector<32xf32>
    %259 = vector.multi_reduction <add>, %258, %cst_69 [1] : vector<32x32xf32> to vector<32xf32>
    %260 = vector.shape_cast %259 : vector<32xf32> to vector<32x1xf32>
    %261 = vector.broadcast %260 : vector<32x1xf32> to vector<32x128xf32>
    %262 = arith.addf %23, %261 : vector<32x128xf32>
    %cst_70 = arith.constant 0.000000e+00 : f32
    %263 = vector.broadcast %cst_70 : f32 to vector<32x128xf32>
    %264 = arith.maximumf %262, %263 : vector<32x128xf32>
    %265 = arith.mulf %29, %264 : vector<32x128xf32>
    %cst_71 = arith.constant dense<0.000000e+00> : vector<128xf32>
    %266 = vector.multi_reduction <add>, %265, %cst_71 [0] : vector<32x128xf32> to vector<128xf32>
    %267 = vector.shape_cast %266 : vector<128xf32> to vector<1x128xf32>
    %268 = arith.addf %267, %35 : vector<1x128xf32>
    %cst_72 = arith.constant dense<0xFF800000> : vector<1xf32>
    %269 = vector.multi_reduction <maximumf>, %268, %cst_72 [1] : vector<1x128xf32> to vector<1xf32>
    %270 = vector.shape_cast %269 : vector<1xf32> to vector<1x1xf32>
    %271 = vector.broadcast %270 : vector<1x1xf32> to vector<1x128xf32>
    %272 = arith.subf %268, %271 : vector<1x128xf32>
    %273 = math.exp %272 : vector<1x128xf32>
    %cst_73 = arith.constant dense<0.000000e+00> : vector<1xf32>
    %274 = vector.multi_reduction <add>, %273, %cst_73 [1] : vector<1x128xf32> to vector<1xf32>
    %275 = vector.shape_cast %274 : vector<1xf32> to vector<1x1xf32>
    %276 = math.log %275 : vector<1x1xf32>
    %277 = arith.addf %270, %276 : vector<1x1xf32>
    %278 = vector.broadcast %277 : vector<1x1xf32> to vector<1x128xf32>
    %279 = arith.subf %268, %278 : vector<1x128xf32>
    %cst_74 = arith.constant 0.000000e+00 : f32
    %280 = vector.broadcast %cst_74 : f32 to vector<4x128xf32>
    %281 = tpu.concatenate %87, %151, %215, %279, %280 in 0 : vector<1x128xf32>, vector<1x128xf32>, vector<1x128xf32>, vector<1x128xf32>, vector<4x128xf32> -> vector<8x128xf32>
    %c0_75 = arith.constant 0 : index
    %c0_76 = arith.constant 0 : index
    %282 = vector.load %arg3[%c0_75, %c0_76] : memref<8x128xf32, #tpu.memory_space<vmem>>, vector<8x128xf32>
    tpu.vector_store %arg3[%c0_75, %c0_76], %281 {strides = array<i32>} : memref<8x128xf32, #tpu.memory_space<vmem>>, vector<8x128xf32>,
    return
  }
}

</mosaic_0001>

<bundles_post_ra>
// kernel: tpu_custom_call.1
= control target key start
LH: loop header
LB: loop body
LE: loop exit
PB: predicated region body
PF: predicated region fallthrough
CT: control target
= control target key end

     0   :  { %8 = vsyncpa [#allocation3], 0  ;;  %s1720_s0 = inlined_call_operand.hbm [shape: f32[8,16], index: 0, kind: input, shape index: {}]   ;;  %s1721_s1 = inlined_call_operand.hbm [shape: f32[8,128], index: 1, kind: input, shape index: {}]   ;;  %s1722_s2 = inlined_call_operand.hbm [shape: f32[240,128], index: 2, kind: input, shape index: {}]   ;;  %s1723_s3 = inlined_call_operand.hbm [shape: f32[8,128], index: 3, kind: output, shape index: {}]  }
   0x1   :  { %9 = vsyncpa [#allocation6], 0 }
   0x2   :  { %10 = vsyncpa [#allocation4], 0  ;;  %s1404_s12 = smov [#allocation5]   ;;  %s1405_s14 = smov [#allocation2]  }
   0x3   :  { %s27_s13 = sshll.u32 %s1404_s12, 4  ;;  %s17_s15 = sshll.u32 %s1405_s14, 4  ;;  %s28_s13 = int_to_ptr.vmem [resolvable:$true] %s27_s13  ;;  %s18_s15 = int_to_ptr.vmem [resolvable:$true] %s17_s15 }
   0x4   :  { %s1326_s16 = scalar_lea.vmem %s28_s13, 128  ;;  %p1331_p1 = scmp.lt.s32.totalorder %s28_s13, %s28_s13 }
   0x5   :  { %p1327_p0 = scmp.ne.s32.totalorder %s28_s13, %s1326_s16  ;;  %p1332_p2 = scmp.lt.s32.totalorder %s1326_s16, %s1326_s16 }
   0x7   :  { %p1333_p3 = por %p1332_p2, %p1331_p1 }
   0x9   :  { %p1334_p4 = pnand %p1333_p3, %p1327_p0 }
   0xb   :  { %1337 = shalt.err (!%p1334_p4)
}
   0xc   :  { %30 = dma.hbm_to_vmem [thread:$0]  %s1721_s1, 128, %s28_s13, [#allocation6]  }
   0xd   :  { %s1346_s19 = scalar_lea.vmem %s18_s15, 128  ;;  %p1351_p6 = scmp.lt.s32.totalorder %s18_s15, %s18_s15 }
   0xe   :  { %p1347_p5 = scmp.ne.s32.totalorder %s18_s15, %s1346_s19  ;;  %p1352_p7 = scmp.lt.s32.totalorder %s1346_s19, %s1346_s19 }
  0x10   :  { %p1353_p8 = por %p1352_p7, %p1351_p6 }
  0x12   :  { %p1354_p9 = pnand %p1353_p8, %p1347_p5 }
  0x14   :  { %1357 = shalt.err (!%p1354_p9)
}
  0x15   :  { %20 = dma.hbm_to_vmem [thread:$0]  %s1720_s0, 128, %s18_s15, [#allocation3]  }
  0x16   :  { %s1406_s22 = smov [#allocation7]  }
  0x17   :  { %s36_s23 = sshll.u32 %s1406_s22, 4  ;;  %s37_s23 = int_to_ptr.vmem [resolvable:$true] %s36_s23 }
  0x18   :  { %s1366_s24 = scalar_lea.vmem %s37_s23, 3840  ;;  %p1371_p11 = scmp.lt.s32.totalorder %s37_s23, %s37_s23 }
  0x19   :  { %p1367_p10 = scmp.ne.s32.totalorder %s37_s23, %s1366_s24  ;;  %p1372_p12 = scmp.lt.s32.totalorder %s1366_s24, %s1366_s24 }
  0x1b   :  { %p1373_p13 = por %p1372_p12, %p1371_p11 }
  0x1d   :  { %p1374_p0 = pnand %p1373_p13, %p1367_p10 }
  0x1f   :  { %1377 = shalt.err (!%p1374_p0)
}
  0x20   :  { %s1407_s1 = smov 128   ;;  %s1408_s25 = smov 8  }
  0x21   :  { %42 = dma.hbm_to_vmem [thread:$0]  %s1722_s2, 3840, %s37_s23, [#allocation6], %s1407_s1, %s1407_s1, %s1408_s25  }
  0x22   :  { %1398 = dma.done.wait [#allocation3], 128  }
  0x23   :  { %1399 = vsyncadd [#allocation3], 4294967168 }
  0x24   :  { %1400 = dma.done.wait [#allocation6], 3968  }
  0x25   :  { %1401 = vsyncadd [#allocation6], 4294963328  ;;  %v1409_v0 = vmov 0.0   ;;  %vm1410_vm0 = vmmov 0   ;;  %v53_v1 = vld [vmem:[#allocation7 + $0x8] sm:$0xff]  ;;  %v52_v2 = vld [vmem:[#allocation7] sm:$0xff] }
  0x26   :  { %1194 = vmatprep.subr.mxu0 %v1409_v0  ;;  %1198 = vmatprep.mubr.msk.f32.mxu0 %vm1410_vm0, %v1409_v0  ;;  %v82_v3 = vld [vmem:[#allocation2] sm:$0xff]  ;;  %vm88_vm1 = vcmask 130048   ;;  %v57_v5 = vld [vmem:[#allocation7 + $0x28] sm:$0xff]  ;;  %v56_v6 = vld [vmem:[#allocation7 + $0x20] sm:$0xff]  ;;  %vm261_vm2 = vcmask 64512   ;;  %vm167_vm3 = vcmask 261120  }
  0x27   :  { %1201 = vmatprep.subr.mxu1 %v1409_v0  ;;  %1209 = vmatprep.mubr.msk.f32.mxu1 %vm1410_vm0, %v1409_v0  ;;  %v58_v4 = vld [vmem:[#allocation7 + $0x30] sm:$0xff]  ;;  %v55_v7 = vld [vmem:[#allocation7 + $0x18] sm:$0xff]  ;;  %v60_v9 = vld [vmem:[#allocation7 + $0x40] sm:$0xff]  ;;  %s1411_s0 = smov 64   ;;  %s1412_s2 = smov 32   ;;  %v1413_v48 = vmov 0  }
  0x28   :  { %1195 = vmatpush3.msra.mxu0 %v53_v1  ;;  %1202 = vmatpush3.msra.mxu1 %v58_v4  ;;  %v1455_v8 = vld [vmem:[#allocation5] sm:$0xff]  ;;  %v61_v10 = vld [vmem:[#allocation7 + $0x48] sm:$0xff]  ;;  %v62_v12 = vld [vmem:[#allocation7 + $0x50] sm:$0xff]  ;;  %vm491_vm4 = vcmask 1048320   ;;  %vm1111_vm15 = vcmask 1040384   ;;  %s1415_s28 = smov [#allocation8]  }
  0x29   :  { %1196 = vmatprep.subr.mxu0 %v1409_v0  ;;  %1203 = vmatprep.subr.mxu1 %v1409_v0  ;;  %v1460_v11 = vld [vmem:[#allocation7 + $0xd8] sm:$0xff]  ;;  %v1465_v13 = vld [vmem:[#allocation7 + $0xd0] sm:$0xff]  ;;  %v1470_v15 = vld [vmem:[#allocation7 + $0xc8] sm:$0xff]  ;;  %s1126_s29 = sshll.u32 %s1415_s28, 4  ;;  %s1127_s29 = int_to_ptr.vmem [resolvable:$true] %s1126_s29 }
  0x2a   :  { %1197 = vmatpush3.msra.mxu0 %v52_v2  ;;  %1204 = vmatpush3.msra.mxu1 %v57_v5  ;;  %v63_v14 = vld [vmem:[#allocation7 + $0x58] sm:$0xff]  ;;  %v1136_v16 = vld [vmem:[#allocation7 + $0x10] ss:$0 sm:$0xff]  ;;  %v1488_v21 = vld [vmem:[#allocation7 + $0xc0] sm:$0xff]  ;;  %s1378_s30 = scalar_lea.vmem %s1127_s29, 128  ;;  %p1383_p2 = scmp.lt.s32.totalorder %s1127_s29, %s1127_s29 }
  0x2b   :  { %1199 = vmatmul.mubr.msk.f32.vlgmr.msra.gmra.mxu0 %vm88_vm1, %v82_v3  ;;  %1205 = vmatprep.subr.mxu1 %v1409_v0  ;;  %v1138_v22 = vld [vmem:[#allocation7 + $0x38] ss:$0 sm:$0xff]  ;;  %v1512_v30 = vld [vmem:[#allocation7 + $0xe0] ss:$0 sm:$0xff]  ;;  %v1514_v31 = vld [vmem:[#allocation7 + $0xe8] ss:$0 sm:$0xff]  ;;  %p1379_p1 = scmp.ne.s32.totalorder %s1127_s29, %s1378_s30  ;;  %p1384_p3 = scmp.lt.s32.totalorder %s1378_s30, %s1378_s30 }
  0x2c   :  { %1206 = vmatpush3.msra.mxu1 %v56_v6  ;;  %1212 = vmatprep.subr.mxu0 %v1455_v8  ;;  %v68_v59 = vld [vmem:[#allocation7 + $0x80] sm:$0xff]  ;;  %v1526_v60 = vld [vmem:[#allocation7 + $0x68] sm:$0xff]  ;;  %v1530_v63 = vld [vmem:[#allocation7 + $0x70] sm:$0xff]  ;;  %vm1115_vm1 = vcmask 1042432  }
  0x2d   :  { %1207 = vmatprep.subr.mxu1 %v1409_v0  ;;  %1214 = vmatprep.mubr.msk.f32.mxu0 %vm261_vm2, %v60_v9  ;;  %v1528_v61 = vld [vmem:[#allocation7 + $0x60] sm:$0xff]  ;;  %v1537_v6 = vld [vmem:[#allocation7 + $0x78] sm:$0xff]  ;;  %p1385_p4 = por %p1384_p3, %p1383_p2 }
  0x2e   :  { %1208 = vmatpush3.msra.mxu1 %v55_v7  ;;  %1213 = vmatpush3.msra.mxu0 %v1455_v8 }
  0x2f   :  { %1231 = vmatprep.subr.mxu1 %v1409_v0  ;;  %1215 = vmatmul.mubr.msk.f32.vlgmr.msra.gmra.mxu0 %vm261_vm2, %v61_v10  ;;  %p1386_p5 = pnand %p1385_p4, %p1379_p1 }
  0x30   :  { %1220 = vmatprep.subr.mxu0 %v1409_v0  ;;  %1217 = vmatprep.mubr.msk.f32.mxu0 %vm261_vm2, %v62_v12  ;;  %v70_v12 = vld [vmem:[#allocation7 + $0x90] sm:$0xff] }
  0x31   :  { %1221 = vmatpush3.msra.mxu0 %v1460_v11  ;;  %1276 = vset.pattern.permute.xlu1 %v1413_v48 }
  0x32   :  { %1222 = vmatprep.subr.mxu0 %v1409_v0  ;;  %1277 = vset.pattern.permute.xlu0 %v1413_v48 }
  0x33   :  { %1223 = vmatpush3.msra.mxu0 %v1465_v13 }
  0x34   :  { %1218 = vmatmul.mubr.msk.f32.gmra.mxu0 %vm261_vm2, %v63_v14  ;;  %1224 = vmatprep.subr.mxu0 %v1409_v0  ;;  %v71_v14 = vld [vmem:[#allocation7 + $0x98] sm:$0xff]  ;;  %vm1117_vm2 = vcmask 1043456  }
  0x35   :  { %1225 = vmatpush3.msra.mxu0 %v1470_v15  ;;  %1228 = vmatprep.mubr.msk.f32.mxu0 %vm1410_vm0, %v1409_v0 }
  0x36   :  { %1226 = vmatprep.subr.mxu0 %v1409_v0 }
  0x37   :  { %1227 = vmatpush3.msra.mxu0 %v1488_v21 }
  0x38   :  { %1242 = vmatprep.subr.mxu0 %v1409_v0 }
  0xeb   :  { %v158_v17 = vpop.f32.mrf.mxu0 }
  0xec   :  { %v159_v18 = vadd.f32 %v1136_v16, %v158_v17  ;;  %v72_v16 = vld [vmem:[#allocation7 + $0xa0] sm:$0xff]  ;;  %v73_v17 = vld [vmem:[#allocation7 + $0xa8] sm:$0xff] }
  0xed   :  { %v1200_v19 = vpop.f32.mrf.mxu0 }
  0xee   :  { %v162_v20 = vmax.f32 %v159_v18, 0.0  ;;  %v69_v18 = vld [vmem:[#allocation7 + $0x88] sm:$0xff]  ;;  %v74_v19 = vld [vmem:[#allocation7 + $0xb0] sm:$0xff] }
  0xef   :  { %v1504_v26 = vpop.f32.mrf.mxu0 }
  0xf0   :  { %1210 = vmatmul.mubr.msk.f32.vlgmr.msra.gmra.mxu1 %vm167_vm3, %v162_v20  ;;  %v75_v20 = vld [vmem:[#allocation7 + $0xb8] sm:$0xff] }
  0xf1   :  { %1232 = vmatpush3.msra.mxu1 %v1460_v11  ;;  %1239 = vmatprep.mubr.msk.f32.mxu1 %vm1410_vm0, %v1409_v0  ;;  %v1506_v27 = vpop.f32.mrf.mxu0 }
  0xf2   :  { %1233 = vmatprep.subr.mxu1 %v1409_v0 }
  0xf3   :  { %1234 = vmatpush3.msra.mxu1 %v1465_v13 }
  0xf4   :  { %1235 = vmatprep.subr.mxu1 %v1409_v0  ;;  %v1508_v28 = vpop.f32.mrf.mxu0 }
  0xf5   :  { %1236 = vmatpush3.msra.mxu1 %v1470_v15 }
  0xf6   :  { %1237 = vmatprep.subr.mxu1 %v1409_v0  ;;  %v1510_v29 = vpop.f32.mrf.mxu0 }
  0xf7   :  { %1238 = vmatpush3.msra.mxu1 %v1488_v21 }
  0xf8   :  { %1253 = vmatprep.subr.mxu1 %v1409_v0 }
 0x1b0   :  { %v237_v23 = vpop.f32.mrf.mxu1 }
 0x1b1   :  { %v238_v24 = vadd.f32 %v1138_v22, %v237_v23 }
 0x1b2   :  { %v1211_v25 = vpop.f32.mrf.mxu1 }
 0x1b3   :  { %1229 = vmatmul.mubr.msk.f32.vlgmr.msra.gmra.mxu0 %vm167_vm3, %v238_v24 }
 0x1b4   :  { %1243 = vmatpush3.msra.mxu0 %v1460_v11  ;;  %1250 = vmatprep.mubr.msk.f32.mxu0 %vm1410_vm0, %v1409_v0 }
 0x1b5   :  { %1244 = vmatprep.subr.mxu0 %v1409_v0 }
 0x1b6   :  { %1245 = vmatpush3.msra.mxu0 %v1465_v13 }
 0x1b7   :  { %1246 = vmatprep.subr.mxu0 %v1409_v0 }
 0x1b8   :  { %1247 = vmatpush3.msra.mxu0 %v1470_v15 }
 0x1b9   :  { %1248 = vmatprep.subr.mxu0 %v1409_v0 }
 0x1ba   :  { %1249 = vmatpush3.msra.mxu0 %v1488_v21 }
 0x273   :  { %v460_v32 = vpop.f32.mrf.mxu0 }
 0x274   :  { %v464_v33 = vadd.f32 %v1512_v30, %v460_v32 }
 0x275   :  { %v1230_v34 = vpop.f32.mrf.mxu0 }
 0x276   :  { %v465_v35 = vadd.f32 %v1514_v31, %v464_v33 }
 0x278   :  { %v1147_v36 = vmul.f32 -1.442695, %v465_v35 }
 0x27a   :  { %1278 = vpow2.f32 %v1147_v36 }
 0x287   :  { %v1279_v37 = vpop.eup %1278 }
 0x288   :  { %v469_v38 = vadd.f32 1.0, %v1279_v37 }
 0x28a   :  { %1280 = vrcp.f32 %v469_v38 }
 0x297   :  { %v1281_v39 = vpop.eup %1280 }
 0x298   :  { %v472_v40 = vmul.f32 2.0, %v1281_v39  ;;  %v474_v44 = vmul.f32 0.0, %v1281_v39 }
 0x29a   :  { %v1148_v41 = vadd.f32 -1.0, %v472_v40 }
 0x29c   :  { %476 = vrot.lane.b32.xlu0 %v1148_v41, %s1411_s0 }
 0x30e   :  { %v477_v42 = vpop.permute.xlu0 %476 }
 0x30f   :  { %v479_v43 = vmul.f32 %v1281_v39, %v477_v42 }
 0x311   :  { %481 = vrot.lane.b32.xlu0 %v479_v43, %s1412_s2 }
 0x383   :  { %v482_v45 = vpop.permute.xlu0 %481 }
 0x384   :  { %v1520_v46 = vadd.f32 %v482_v45, %v474_v44 }
 0x386   :  { %1282 = vtanh.f32 %v1520_v46 }
 0x393   :  { %v1283_v47 = vpop.eup %1282 }
 0x394   :  { %487 = vrot.lane.b32.xlu1 %v1283_v47, %s1411_s0 }
 0x406   :  { %v488_v49 = vpop.permute.xlu1 %487 }
 0x407   :  { %v490_v50 = vmul.f32 %v1281_v39, %v488_v49 }
 0x409   :  { %v492_v51 = vsel %vm491_vm4, %v490_v50, 0.0 }
 0x40a   :  { %v493_v52 = vrot.slane %v492_v51, 4 }
 0x40c   :  { %v494_v53 = vadd.f32 %v493_v52, %v492_v51 }
 0x40e   :  { %v495_v54 = vrot.slane %v494_v53, 2 }
 0x410   :  { %v496_v55 = vadd.f32 %v495_v54, %v494_v53 }
 0x412   :  { %v497_v56 = vrot.slane %v496_v55, 1 }
 0x414   :  { %v498_v57 = vadd.f32 %v497_v56, %v496_v55  ;;  %v387_v56 = vlaneseq }
 0x416   :  { %v499_v58 = vmul.f32 0.125, %v498_v57 }
 0x418   :  { %501 = vrot.lane.b32.xlu1 %v499_v58, %s1412_s2 }
 0x41c   :  { %243 = vperm.xlu1 %1276, %v68_v59  }
 0x48a   :  { %v502_v62 = vpop.permute.xlu1 %501 }
 0x48b   :  { %v505_v1 = vmul.f32 %v502_v62, %v1526_v60  ;;  %v504_v2 = vmul.f32 %v502_v62, %v1528_v61  ;;  %v506_v5 = vmul.f32 %v502_v62, %v1530_v63  ;;  %v507_v9 = vmul.f32 %v502_v62, %v1537_v6 }
 0x48d   :  { %v511_v3 = vsel %vm167_vm3, %v505_v1, 0.0  ;;  %v508_v4 = vsel %vm167_vm3, %v504_v2, 0.0  ;;  %v514_v7 = vsel %vm167_vm3, %v506_v5, 0.0  ;;  %v517_v10 = vsel %vm167_vm3, %v507_v9, 0.0 }
 0x48e   :  { %512 = vadd.xlane.f32.xlu1 %v511_v3  ;;  %509 = vadd.xlane.f32.xlu0 %v508_v4  ;;  %v1414_v2 = vmov -1e+30  }
 0x492   :  { %515 = vadd.xlane.f32.xlu0 %v514_v7 }
 0x496   :  { %518 = vadd.xlane.f32.xlu0 %v517_v10 }
 0x497   :  { %v244_v22 = vpop.permute.xlu1 %243 }
 0x498   :  { %v1546_v36 = vadd.f32 %v1506_v27, %v244_v22 }
 0x49f   :  { %253 = vperm.xlu1 %1276, %v70_v12  }
 0x4a3   :  { %258 = vperm.xlu1 %1276, %v71_v14  }
 0x4a7   :  { %369 = vperm.xlu1 %1276, %v72_v16  }
 0x4ab   :  { %374 = vperm.xlu1 %1276, %v73_v17  }
 0x4ac   :  { %248 = vperm.xlu0 %1277, %v69_v18  }
 0x4af   :  { %379 = vperm.xlu1 %1276, %v74_v19  }
 0x4b0   :  { %577 = vrot.lane.b32.xlu0 %v490_v50, %s1412_s2 }
 0x4b3   :  { %384 = vperm.xlu1 %1276, %v75_v20  }
 0x517   :  { %v510_v23 = vpop.xlane.xlu0 %509  ;;  %v513_v24 = vpop.xlane.xlu1 %512 }
 0x518   :  { %v520_v40 = vadd.f32 %v510_v23, %v1546_v36 }
 0x51b   :  { %v254_v25 = vpop.permute.xlu1 %253  ;;  %v516_v32 = vpop.xlane.xlu0 %515 }
 0x51c   :  { %v1549_v37 = vadd.f32 %v1510_v29, %v254_v25  ;;  %v524_v29 = vmax.f32 %v520_v40, 0.0 }
 0x51e   :  { %v522_v44 = vadd.f32 %v516_v32, %v1549_v37 }
 0x51f   :  { %v259_v33 = vpop.permute.xlu1 %258  ;;  %v519_v34 = vpop.xlane.xlu0 %518 }
 0x520   :  { %v1555_v41 = vadd.f32 %v1508_v28, %v259_v33  ;;  %v526_v49 = vmax.f32 %v522_v44, 0.0 }
 0x522   :  { %v523_v48 = vadd.f32 %v519_v34, %v1555_v41 }
 0x523   :  { %v1543_v35 = vpop.permute.xlu1 %369 }
 0x524   :  { %v527_v53 = vmax.f32 %v523_v48, 0.0 }
 0x527   :  { %v249_v38 = vpop.permute.xlu0 %248  ;;  %v1551_v39 = vpop.permute.xlu1 %374 }
 0x528   :  { %v1558_v42 = vadd.f32 %v1504_v26, %v249_v38  ;;  %v528_v26 = vmul.f32 %v524_v29, %v1543_v35 }
 0x52a   :  { %v521_v43 = vadd.f32 %v513_v24, %v1558_v42 }
 0x52b   :  { %v578_v27 = vpop.permute.xlu0 %577  ;;  %v1562_v45 = vpop.permute.xlu1 %379 }
 0x52c   :  { %v525_v47 = vmax.f32 %v521_v43, 0.0  ;;  %1240 = vmatmul.mubr.msk.f32.vlgmr.msra.gmra.mxu1 %vm167_vm3, %v578_v27  ;;  %v530_v52 = vmul.f32 %v526_v49, %v1562_v45 }
 0x52d   :  { %1254 = vmatpush3.msra.mxu1 %v1460_v11  ;;  %1261 = vmatprep.mubr.msk.f32.mxu1 %vm1410_vm0, %v1409_v0  ;;  %vm1113_vm0 = vcmask 1041408  }
 0x52e   :  { %v529_v28 = vmul.f32 %v525_v47, %v1551_v39  ;;  %1255 = vmatprep.subr.mxu1 %v1409_v0 }
 0x52f   :  { %v1572_v50 = vpop.permute.xlu1 %384  ;;  %1256 = vmatpush3.msra.mxu1 %v1465_v13  ;;  %v1581_v13 = vand.u32 127, %v387_v56 }
 0x530   :  { %v532_v51 = vadd.f32 %v529_v28, %v528_v26  ;;  %1257 = vmatprep.subr.mxu1 %v1409_v0  ;;  %v531_v54 = vmul.f32 %v527_v53, %v1572_v50 }
 0x531   :  { %1258 = vmatpush3.msra.mxu1 %v1470_v15  ;;  %vm389_vm5 = vcmp.lt.s32.totalorder %v1581_v13, 16 }
 0x532   :  { %v533_v11 = vadd.f32 %v532_v51, %v530_v52  ;;  %1259 = vmatprep.subr.mxu1 %v1409_v0  ;;  %v1584_v15 = vsel %vm389_vm5, 0.0, %v1414_v2 }
 0x533   :  { %1260 = vmatpush3.msra.mxu1 %v1488_v21 }
 0x534   :  { %v534_v55 = vadd.f32 %v533_v11, %v531_v54 }
 0x536   :  { %v535_v57 = vrot.slane %v534_v55, 4 }
 0x538   :  { %v536_v58 = vadd.f32 %v535_v57, %v534_v55 }
 0x53a   :  { %v537_v59 = vrot.slane %v536_v58, 2 }
 0x53c   :  { %v538_v62 = vadd.f32 %v537_v59, %v536_v58 }
 0x53e   :  { %v539_v1 = vrot.slane %v538_v62, 1 }
 0x540   :  { %v540_v3 = vadd.f32 %v539_v1, %v538_v62 }
 0x542   :  { %v1587_v4 = vadd.f32 %v540_v3, %v1584_v15 }
 0x544   :  { %542 = vmax.xlane.f32.xlu1 %v1587_v4 }
 0x5cd   :  { %v1590_v21 = vpop.xlane.xlu1 %542 }
 0x5ce   :  { %vm553_vm6 = vcmp.eq.f32.partialorder %v1587_v4, %v1590_v21 }
 0x5cf   :  { %v554_v5 = vsel %vm553_vm6, %v1581_v13, 128 }
 0x5d0   :  { %v556_v7 = vshra.s32 %v554_v5, 16  ;;  %v555_v14 = vand.u32 65535, %v554_v5 }
 0x5d2   :  { %v558_v9 = vcvt.s32.f32 %v556_v7  ;;  %v557_v17 = vcvt.s32.f32 %v555_v14 }
 0x5d4   :  { %559 = vmin.xlane.f32.xlu0 %v558_v9 }
 0x5ec   :  { %v647_v10 = vpop.f32.mrf.mxu1 }
 0x5ee   :  { %v1241_v12 = vpop.f32.mrf.mxu1 }
 0x65d   :  { %v560_v16 = vpop.xlane.xlu0 %559 }
 0x65e   :  { %vm561_vm7 = vcmp.eq.f32.partialorder %v558_v9, %v560_v16  ;;  %v566_v19 = vcvt.f32.s32 %v560_v16 }
 0x65f   :  { %v562_v18 = vsel %vm561_vm7, %v557_v17, inf }
 0x660   :  { %563 = vmin.xlane.f32.xlu1 %v562_v18  ;;  %v567_v22 = vshll.u32 %v566_v19, 16 }
 0x6e9   :  { %v564_v20 = vpop.xlane.xlu1 %563 }
 0x6ea   :  { %v565_v23 = vcvt.f32.s32 %v564_v20 }
 0x6ec   :  { %v568_v24 = vadd.s32 %v567_v22, %v565_v23 }
 0x6ee   :  { %vm569_vm8 = vcmp.eq.s32.totalorder %v1581_v13, %v568_v24 }
 0x6ef   :  { %v1149_v25 = vsel %vm569_vm8, 1.0, %v1409_v0 }
 0x6f0   :  { %v572_v32 = vmul.f32 %v1149_v25, %v1455_v8 }
 0x6f2   :  { %573 = vadd.xlane.f32.xlu1 %v572_v32 }
 0x77b   :  { %v574_v33 = vpop.xlane.xlu1 %573 }
 0x77c   :  { %v575_v34 = vmul.f32 %v1512_v30, %v574_v33 }
 0x77e   :  { %v651_v38 = vadd.f32 %v647_v10, %v575_v34 }
 0x780   :  { %v652_v40 = vadd.f32 %v1514_v31, %v651_v38 }
 0x782   :  { %v1151_v43 = vmul.f32 -1.442695, %v652_v40 }
 0x784   :  { %1284 = vpow2.f32 %v1151_v43 }
 0x791   :  { %v1285_v44 = vpop.eup %1284 }
 0x792   :  { %v656_v27 = vadd.f32 1.0, %v1285_v44 }
 0x794   :  { %1286 = vrcp.f32 %v656_v27 }
 0x7a1   :  { %v1287_v29 = vpop.eup %1286 }
 0x7a2   :  { %v659_v47 = vmul.f32 2.0, %v1287_v29  ;;  %v661_v49 = vmul.f32 %v1287_v29, %v1520_v46 }
 0x7a4   :  { %v1152_v48 = vadd.f32 -1.0, %v659_v47 }
 0x7a6   :  { %663 = vrot.lane.b32.xlu0 %v1152_v48, %s1411_s0 }
 0x818   :  { %v664_v26 = vpop.permute.xlu0 %663 }
 0x819   :  { %v666_v28 = vmul.f32 %v1287_v29, %v664_v26 }
 0x81b   :  { %668 = vrot.lane.b32.xlu1 %v666_v28, %s1412_s2 }
 0x88d   :  { %v669_v51 = vpop.permute.xlu1 %668 }
 0x88e   :  { %v1603_v52 = vadd.f32 %v669_v51, %v661_v49 }
 0x890   :  { %1288 = vtanh.f32 %v1603_v52 }
 0x89d   :  { %v1289_v53 = vpop.eup %1288 }
 0x89e   :  { %674 = vrot.lane.b32.xlu1 %v1289_v53, %s1411_s0 }
 0x910   :  { %v675_v11 = vpop.permute.xlu1 %674 }
 0x911   :  { %v677_v54 = vmul.f32 %v1287_v29, %v675_v11 }
 0x913   :  { %v678_v55 = vsel %vm491_vm4, %v677_v54, 0.0 }
 0x914   :  { %v679_v56 = vrot.slane %v678_v55, 4 }
 0x916   :  { %v680_v57 = vadd.f32 %v679_v56, %v678_v55 }
 0x918   :  { %v681_v58 = vrot.slane %v680_v57, 2 }
 0x91a   :  { %v682_v59 = vadd.f32 %v681_v58, %v680_v57 }
 0x91c   :  { %v683_v62 = vrot.slane %v682_v59, 1 }
 0x91e   :  { %v684_v1 = vadd.f32 %v683_v62, %v682_v59 }
 0x920   :  { %v685_v2 = vmul.f32 0.125, %v684_v1 }
 0x922   :  { %687 = vrot.lane.b32.xlu0 %v685_v2, %s1412_s2 }
 0x994   :  { %v688_v46 = vpop.permute.xlu0 %687 }
 0x995   :  { %v691_v3 = vmul.f32 %v688_v46, %v1526_v60  ;;  %v690_v5 = vmul.f32 %v688_v46, %v1528_v61  ;;  %v692_v10 = vmul.f32 %v688_v46, %v1530_v63  ;;  %v693_v12 = vmul.f32 %v688_v46, %v1537_v6 }
 0x997   :  { %v697_v7 = vsel %vm167_vm3, %v691_v3, 0.0  ;;  %v694_v9 = vsel %vm167_vm3, %v690_v5, 0.0  ;;  %v700_v14 = vsel %vm167_vm3, %v692_v10, 0.0  ;;  %v703_v16 = vsel %vm167_vm3, %v693_v12, 0.0 }
 0x998   :  { %698 = vadd.xlane.f32.xlu0 %v697_v7  ;;  %695 = vadd.xlane.f32.xlu1 %v694_v9 }
 0x99c   :  { %701 = vadd.xlane.f32.xlu0 %v700_v14  ;;  %704 = vadd.xlane.f32.xlu1 %v703_v16 }
 0x9ad   :  { %763 = vrot.lane.b32.xlu1 %v677_v54, %s1412_s2 }
 0xa21   :  { %v699_v17 = vpop.xlane.xlu0 %698  ;;  %v696_v18 = vpop.xlane.xlu1 %695 }
 0xa22   :  { %v707_v19 = vadd.f32 %v699_v17, %v1558_v42  ;;  %v706_v20 = vadd.f32 %v696_v18, %v1546_v36 }
 0xa24   :  { %v711_v22 = vmax.f32 %v707_v19, 0.0  ;;  %v710_v23 = vmax.f32 %v706_v20, 0.0 }
 0xa25   :  { %v702_v24 = vpop.xlane.xlu0 %701  ;;  %v705_v25 = vpop.xlane.xlu1 %704 }
 0xa26   :  { %v715_v32 = vmul.f32 %v711_v22, %v1551_v39  ;;  %v714_v33 = vmul.f32 %v710_v23, %v1543_v35  ;;  %v708_v34 = vadd.f32 %v702_v24, %v1549_v37  ;;  %v709_v38 = vadd.f32 %v705_v25, %v1555_v41 }
 0xa28   :  { %v712_v40 = vmax.f32 %v708_v34, 0.0  ;;  %v713_v43 = vmax.f32 %v709_v38, 0.0  ;;  %v718_v27 = vadd.f32 %v715_v32, %v714_v33 }
 0xa29   :  { %v764_v44 = vpop.permute.xlu1 %763 }
 0xa2a   :  { %v716_v29 = vmul.f32 %v712_v40, %v1562_v45  ;;  %1251 = vmatmul.mubr.msk.f32.vlgmr.msra.gmra.mxu0 %vm167_vm3, %v764_v44  ;;  %v717_v48 = vmul.f32 %v713_v43, %v1572_v50 }
 0xa2c   :  { %v719_v47 = vadd.f32 %v718_v27, %v716_v29 }
 0xa2e   :  { %v720_v26 = vadd.f32 %v719_v47, %v717_v48 }
 0xa30   :  { %v721_v28 = vrot.slane %v720_v26, 4 }
 0xa32   :  { %v722_v49 = vadd.f32 %v721_v28, %v720_v26 }
 0xa34   :  { %v723_v51 = vrot.slane %v722_v49, 2 }
 0xa36   :  { %v724_v53 = vadd.f32 %v723_v51, %v722_v49 }
 0xa38   :  { %v725_v11 = vrot.slane %v724_v53, 1 }
 0xa3a   :  { %v726_v54 = vadd.f32 %v725_v11, %v724_v53 }
 0xa3c   :  { %v1628_v55 = vadd.f32 %v726_v54, %v1584_v15 }
 0xa3e   :  { %728 = vmax.xlane.f32.xlu0 %v1628_v55 }
 0xac7   :  { %v1631_v56 = vpop.xlane.xlu0 %728 }
 0xac8   :  { %vm739_vm9 = vcmp.eq.f32.partialorder %v1628_v55, %v1631_v56 }
 0xac9   :  { %v740_v57 = vsel %vm739_vm9, %v1581_v13, 128 }
 0xaca   :  { %v742_v58 = vshra.s32 %v740_v57, 16  ;;  %v741_v2 = vand.u32 65535, %v740_v57 }
 0xacc   :  { %v744_v59 = vcvt.s32.f32 %v742_v58  ;;  %v743_v3 = vcvt.s32.f32 %v741_v2 }
 0xace   :  { %745 = vmin.xlane.f32.xlu0 %v744_v59 }
 0xaea   :  { %v833_v62 = vpop.f32.mrf.mxu0 }
 0xaec   :  { %v1252_v1 = vpop.f32.mrf.mxu0 }
 0xb57   :  { %v746_v46 = vpop.xlane.xlu0 %745 }
 0xb58   :  { %vm747_vm10 = vcmp.eq.f32.partialorder %v744_v59, %v746_v46  ;;  %v752_v7 = vcvt.f32.s32 %v746_v46 }
 0xb59   :  { %v748_v5 = vsel %vm747_vm10, %v743_v3, inf }
 0xb5a   :  { %749 = vmin.xlane.f32.xlu0 %v748_v5  ;;  %v753_v10 = vshll.u32 %v752_v7, 16 }
 0xbe3   :  { %v750_v9 = vpop.xlane.xlu0 %749 }
 0xbe4   :  { %v751_v12 = vcvt.f32.s32 %v750_v9 }
 0xbe6   :  { %v754_v14 = vadd.s32 %v753_v10, %v751_v12 }
 0xbe8   :  { %vm755_vm11 = vcmp.eq.s32.totalorder %v1581_v13, %v754_v14 }
 0xbe9   :  { %v1153_v16 = vsel %vm755_vm11, 1.0, %v1409_v0 }
 0xbea   :  { %v758_v17 = vmul.f32 %v1153_v16, %v1455_v8 }
 0xbec   :  { %759 = vadd.xlane.f32.xlu0 %v758_v17 }
 0xc75   :  { %v760_v18 = vpop.xlane.xlu0 %759 }
 0xc76   :  { %v761_v19 = vmul.f32 %v1512_v30, %v760_v18 }
 0xc78   :  { %v837_v20 = vadd.f32 %v833_v62, %v761_v19 }
 0xc7a   :  { %v838_v22 = vadd.f32 %v1514_v31, %v837_v20 }
 0xc7c   :  { %v1155_v23 = vmul.f32 -1.442695, %v838_v22 }
 0xc7e   :  { %1290 = vpow2.f32 %v1155_v23 }
 0xc8b   :  { %v1291_v24 = vpop.eup %1290 }
 0xc8c   :  { %v842_v25 = vadd.f32 1.0, %v1291_v24 }
 0xc8e   :  { %1292 = vrcp.f32 %v842_v25 }
 0xc9b   :  { %v1293_v32 = vpop.eup %1292 }
 0xc9c   :  { %v845_v33 = vmul.f32 2.0, %v1293_v32  ;;  %v847_v43 = vmul.f32 %v1293_v32, %v1603_v52 }
 0xc9e   :  { %v1156_v34 = vadd.f32 -1.0, %v845_v33 }
 0xca0   :  { %849 = vrot.lane.b32.xlu0 %v1156_v34, %s1411_s0 }
 0xd12   :  { %v850_v38 = vpop.permute.xlu0 %849 }
 0xd13   :  { %v852_v40 = vmul.f32 %v1293_v32, %v850_v38 }
 0xd15   :  { %854 = vrot.lane.b32.xlu1 %v852_v40, %s1412_s2 }
 0xd87   :  { %v855_v44 = vpop.permute.xlu1 %854 }
 0xd88   :  { %v1644_v27 = vadd.f32 %v855_v44, %v847_v43 }
 0xd8a   :  { %1294 = vtanh.f32 %v1644_v27 }
 0xd97   :  { %v1295_v29 = vpop.eup %1294 }
 0xd98   :  { %860 = vrot.lane.b32.xlu1 %v1295_v29, %s1411_s0 }
 0xe0a   :  { %v861_v47 = vpop.permute.xlu1 %860 }
 0xe0b   :  { %v863_v48 = vmul.f32 %v1293_v32, %v861_v47 }
 0xe0d   :  { %v864_v26 = vsel %vm491_vm4, %v863_v48, 0.0 }
 0xe0e   :  { %v865_v28 = vrot.slane %v864_v26, 4 }
 0xe10   :  { %v866_v49 = vadd.f32 %v865_v28, %v864_v26 }
 0xe12   :  { %v867_v51 = vrot.slane %v866_v49, 2 }
 0xe14   :  { %v868_v53 = vadd.f32 %v867_v51, %v866_v49 }
 0xe16   :  { %v869_v11 = vrot.slane %v868_v53, 1 }
 0xe18   :  { %v870_v54 = vadd.f32 %v869_v11, %v868_v53 }
 0xe1a   :  { %v871_v57 = vmul.f32 0.125, %v870_v54 }
 0xe1c   :  { %873 = vrot.lane.b32.xlu1 %v871_v57, %s1412_s2 }
 0xe8e   :  { %v874_v52 = vpop.permute.xlu1 %873 }
 0xe8f   :  { %v877_v58 = vmul.f32 %v874_v52, %v1526_v60  ;;  %v876_v59 = vmul.f32 %v874_v52, %v1528_v61  ;;  %v879_v2 = vmul.f32 %v874_v52, %v1537_v6  ;;  %v878_v46 = vmul.f32 %v874_v52, %v1530_v63 }
 0xe91   :  { %v883_v62 = vsel %vm167_vm3, %v877_v58, 0.0  ;;  %v880_v1 = vsel %vm167_vm3, %v876_v59, 0.0  ;;  %v889_v3 = vsel %vm167_vm3, %v879_v2, 0.0  ;;  %v886_v5 = vsel %vm167_vm3, %v878_v46, 0.0 }
 0xe92   :  { %884 = vadd.xlane.f32.xlu0 %v883_v62  ;;  %881 = vadd.xlane.f32.xlu1 %v880_v1 }
 0xe96   :  { %890 = vadd.xlane.f32.xlu0 %v889_v3  ;;  %887 = vadd.xlane.f32.xlu1 %v886_v5 }
 0xeac   :  { %949 = vrot.lane.b32.xlu0 %v863_v48, %s1412_s2 }
 0xf1b   :  { %v885_v7 = vpop.xlane.xlu0 %884  ;;  %v882_v9 = vpop.xlane.xlu1 %881 }
 0xf1c   :  { %v893_v10 = vadd.f32 %v885_v7, %v1558_v42  ;;  %v892_v12 = vadd.f32 %v882_v9, %v1546_v36 }
 0xf1e   :  { %v897_v14 = vmax.f32 %v893_v10, 0.0  ;;  %v896_v16 = vmax.f32 %v892_v12, 0.0 }
 0xf1f   :  { %v891_v17 = vpop.xlane.xlu0 %890  ;;  %v888_v18 = vpop.xlane.xlu1 %887 }
 0xf20   :  { %v901_v19 = vmul.f32 %v897_v14, %v1551_v39  ;;  %v900_v20 = vmul.f32 %v896_v16, %v1543_v35  ;;  %v895_v22 = vadd.f32 %v891_v17, %v1555_v41  ;;  %v894_v23 = vadd.f32 %v888_v18, %v1549_v37 }
 0xf22   :  { %v899_v24 = vmax.f32 %v895_v22, 0.0  ;;  %v898_v25 = vmax.f32 %v894_v23, 0.0  ;;  %v904_v33 = vadd.f32 %v901_v19, %v900_v20 }
 0xf23   :  { %v950_v32 = vpop.permute.xlu0 %949 }
 0xf24   :  { %v902_v34 = vmul.f32 %v898_v25, %v1562_v45  ;;  %1262 = vmatmul.mubr.msk.f32.vlgmr.msra.gmra.mxu1 %vm167_vm3, %v950_v32  ;;  %v903_v38 = vmul.f32 %v899_v24, %v1572_v50 }
 0xf26   :  { %v905_v40 = vadd.f32 %v904_v33, %v902_v34 }
 0xf28   :  { %v906_v43 = vadd.f32 %v905_v40, %v903_v38 }
 0xf2a   :  { %v907_v44 = vrot.slane %v906_v43, 4 }
 0xf2c   :  { %v908_v29 = vadd.f32 %v907_v44, %v906_v43 }
 0xf2e   :  { %v909_v47 = vrot.slane %v908_v29, 2 }
 0xf30   :  { %v910_v48 = vadd.f32 %v909_v47, %v908_v29 }
 0xf32   :  { %v911_v26 = vrot.slane %v910_v48, 1 }
 0xf34   :  { %v912_v28 = vadd.f32 %v911_v26, %v910_v48 }
 0xf36   :  { %v1669_v49 = vadd.f32 %v912_v28, %v1584_v15 }
 0xf38   :  { %914 = vmax.xlane.f32.xlu1 %v1669_v49 }
 0xfc1   :  { %v1672_v51 = vpop.xlane.xlu1 %914 }
 0xfc2   :  { %vm925_vm12 = vcmp.eq.f32.partialorder %v1669_v49, %v1672_v51  ;;  %v916_v28 = vsub.f32 %v1669_v49, %v1672_v51 }
 0xfc3   :  { %v926_v53 = vsel %vm925_vm12, %v1581_v13, 128 }
 0xfc4   :  { %v928_v11 = vshra.s32 %v926_v53, 16  ;;  %v927_v58 = vand.u32 65535, %v926_v53  ;;  %v917_v53 = vmul.f32 1.442695, %v916_v28 }
 0xfc6   :  { %v930_v54 = vcvt.s32.f32 %v928_v11  ;;  %v929_v62 = vcvt.s32.f32 %v927_v58 }
 0xfc8   :  { %931 = vmin.xlane.f32.xlu1 %v930_v54 }
 0xfe4   :  { %v1019_v57 = vpop.f32.mrf.mxu1 }
 0xfe6   :  { %v1263_v52 = vpop.f32.mrf.mxu1 }
0x1051   :  { %v932_v59 = vpop.xlane.xlu1 %931 }
0x1052   :  { %vm933_vm13 = vcmp.eq.f32.partialorder %v930_v54, %v932_v59  ;;  %v938_v2 = vcvt.f32.s32 %v932_v59 }
0x1053   :  { %v934_v1 = vsel %vm933_vm13, %v929_v62, inf }
0x1054   :  { %935 = vmin.xlane.f32.xlu1 %v934_v1  ;;  %v939_v3 = vshll.u32 %v938_v2, 16 }
0x10dd   :  { %v936_v46 = vpop.xlane.xlu1 %935 }
0x10de   :  { %v937_v5 = vcvt.f32.s32 %v936_v46 }
0x10e0   :  { %v940_v7 = vadd.s32 %v939_v3, %v937_v5 }
0x10e2   :  { %vm941_vm14 = vcmp.eq.s32.totalorder %v1581_v13, %v940_v7 }
0x10e3   :  { %v1157_v9 = vsel %vm941_vm14, 1.0, %v1409_v0 }
0x10e4   :  { %v944_v10 = vmul.f32 %v1157_v9, %v1455_v8 }
0x10e6   :  { %945 = vadd.xlane.f32.xlu1 %v944_v10 }
0x116f   :  { %v946_v12 = vpop.xlane.xlu1 %945 }
0x1170   :  { %v947_v14 = vmul.f32 %v1512_v30, %v946_v12 }
0x1172   :  { %v1023_v16 = vadd.f32 %v1019_v57, %v947_v14 }
0x1174   :  { %v1024_v17 = vadd.f32 %v1514_v31, %v1023_v16 }
0x1176   :  { %v1159_v18 = vmul.f32 -1.442695, %v1024_v17 }
0x1178   :  { %1296 = vpow2.f32 %v1159_v18 }
0x1185   :  { %v1297_v19 = vpop.eup %1296 }
0x1186   :  { %v1028_v20 = vadd.f32 1.0, %v1297_v19 }
0x1188   :  { %1298 = vrcp.f32 %v1028_v20 }
0x1195   :  { %v1299_v22 = vpop.eup %1298 }
0x1196   :  { %v1031_v23 = vmul.f32 2.0, %v1299_v22  ;;  %v1033_v8 = vmul.f32 %v1299_v22, %v1644_v27  ;;  %v544_v27 = vsub.f32 %v1587_v4, %v1590_v21 }
0x1198   :  { %v1160_v24 = vadd.f32 -1.0, %v1031_v23  ;;  %v545_v26 = vmul.f32 1.442695, %v544_v27 }
0x119a   :  { %1035 = vrot.lane.b32.xlu1 %v1160_v24, %s1411_s0 }
0x120c   :  { %v1036_v0 = vpop.permute.xlu1 %1035 }
0x120d   :  { %v1038_v13 = vmul.f32 %v1299_v22, %v1036_v0 }
0x120f   :  { %1040 = vrot.lane.b32.xlu0 %v1038_v13, %s1412_s2 }
0x1281   :  { %v1041_v30 = vpop.permute.xlu0 %1040 }
0x1282   :  { %v1043_v25 = vadd.f32 %v1041_v30, %v1033_v8 }
0x1284   :  { %1300 = vtanh.f32 %v1043_v25 }
0x1285   :  { %1302 = vpow2.f32 %v545_v26 }
0x1286   :  { %1304 = vpow2.f32 %v917_v53 }
0x1291   :  { %v1301_v31 = vpop.eup %1300 }
0x1292   :  { %1046 = vrot.lane.b32.xlu0 %v1301_v31, %s1411_s0 }
0x1304   :  { %v1047_v32 = vpop.permute.xlu0 %1046 }
0x1305   :  { %v1049_v33 = vmul.f32 %v1299_v22, %v1047_v32 }
0x1307   :  { %v1050_v34 = vsel %vm491_vm4, %v1049_v33, 0.0 }
0x1308   :  { %v1051_v38 = vrot.slane %v1050_v34, 4 }
0x130a   :  { %v1052_v40 = vadd.f32 %v1051_v38, %v1050_v34 }
0x130c   :  { %v1053_v43 = vrot.slane %v1052_v40, 2 }
0x130e   :  { %v1054_v44 = vadd.f32 %v1053_v43, %v1052_v40 }
0x1310   :  { %v1055_v29 = vrot.slane %v1054_v44, 1 }
0x1312   :  { %v1056_v47 = vadd.f32 %v1055_v29, %v1054_v44 }
0x1314   :  { %v1057_v48 = vmul.f32 0.125, %v1056_v47 }
0x1316   :  { %1059 = vrot.lane.b32.xlu0 %v1057_v48, %s1412_s2 }
0x1388   :  { %v1060_v11 = vpop.permute.xlu0 %1059 }
0x1389   :  { %v1063_v54 = vmul.f32 %v1060_v11, %v1526_v60  ;;  %v1062_v57 = vmul.f32 %v1060_v11, %v1528_v61  ;;  %v1064_v59 = vmul.f32 %v1060_v11, %v1530_v63  ;;  %v1065_v62 = vmul.f32 %v1060_v11, %v1537_v6  ;;  %v1303_v60 = vpop.eup %1302 }
0x138a   :  { %v1305_v61 = vpop.eup %1304 }
0x138b   :  { %v1069_v52 = vsel %vm167_vm3, %v1063_v54, 0.0  ;;  %v1066_v58 = vsel %vm167_vm3, %v1062_v57, 0.0  ;;  %v1072_v1 = vsel %vm167_vm3, %v1064_v59, 0.0  ;;  %v1075_v2 = vsel %vm167_vm3, %v1065_v62, 0.0 }
0x138c   :  { %1070 = vadd.xlane.f32.xlu0 %v1069_v52  ;;  %1067 = vadd.xlane.f32.xlu1 %v1066_v58 }
0x1390   :  { %1073 = vadd.xlane.f32.xlu0 %v1072_v1  ;;  %1076 = vadd.xlane.f32.xlu1 %v1075_v2 }
0x1394   :  { %547 = vadd.xlane.f32.xlu1 %v1303_v60 }
0x1398   :  { %919 = vadd.xlane.f32.xlu1 %v1305_v61 }
0x1415   :  { %v1071_v46 = vpop.xlane.xlu0 %1070  ;;  %v1068_v3 = vpop.xlane.xlu1 %1067 }
0x1416   :  { %v1079_v5 = vadd.f32 %v1071_v46, %v1558_v42  ;;  %v1078_v63 = vadd.f32 %v1068_v3, %v1546_v36  ;;  %v730_v36 = vsub.f32 %v1628_v55, %v1631_v56 }
0x1418   :  { %v1083_v7 = vmax.f32 %v1079_v5, 0.0  ;;  %v1082_v6 = vmax.f32 %v1078_v63, 0.0  ;;  %v731_v0 = vmul.f32 1.442695, %v730_v36 }
0x1419   :  { %v1074_v9 = vpop.xlane.xlu0 %1073  ;;  %v1077_v10 = vpop.xlane.xlu1 %1076 }
0x141a   :  { %v1087_v12 = vmul.f32 %v1083_v7, %v1551_v39  ;;  %v1086_v14 = vmul.f32 %v1082_v6, %v1543_v35  ;;  %v1080_v16 = vadd.f32 %v1074_v9, %v1549_v37  ;;  %v1081_v17 = vadd.f32 %v1077_v10, %v1555_v41 }
0x141b   :  { %1306 = vpow2.f32 %v731_v0 }
0x141c   :  { %v1084_v18 = vmax.f32 %v1080_v16, 0.0  ;;  %v1085_v19 = vmax.f32 %v1081_v17, 0.0  ;;  %v1090_v20 = vadd.f32 %v1087_v12, %v1086_v14 }
0x141e   :  { %v1088_v22 = vmul.f32 %v1084_v18, %v1562_v45  ;;  %v1089_v23 = vmul.f32 %v1085_v19, %v1572_v50  ;;  %v548_v50 = vpop.xlane.xlu1 %547 }
0x1420   :  { %v1091_v42 = vadd.f32 %v1090_v20, %v1088_v22 }
0x1422   :  { %v1092_v24 = vadd.f32 %v1091_v42, %v1089_v23  ;;  %v920_v38 = vpop.xlane.xlu1 %919 }
0x1424   :  { %v1093_v39 = vrot.slane %v1092_v24, 4 }
0x1426   :  { %v1094_v13 = vadd.f32 %v1093_v39, %v1092_v24 }
0x1428   :  { %v1095_v35 = vrot.slane %v1094_v13, 2  ;;  %v1307_v25 = vpop.eup %1306 }
0x142a   :  { %v1096_v37 = vadd.f32 %v1095_v35, %v1094_v13 }
0x142c   :  { %v1097_v8 = vrot.slane %v1096_v37, 1 }
0x142e   :  { %v1098_v41 = vadd.f32 %v1097_v8, %v1096_v37 }
0x1430   :  { %v1099_v30 = vadd.f32 %v1098_v41, %v1584_v15 }
0x1432   :  { %1100 = vmax.xlane.f32.xlu0 %v1099_v30 }
0x1436   :  { %733 = vadd.xlane.f32.xlu0 %v1307_v25 }
0x14bb   :  { %v1101_v45 = vpop.xlane.xlu0 %1100 }
0x14bc   :  { %v1102_v31 = vsub.f32 %v1099_v30, %v1101_v45 }
0x14be   :  { %v1103_v32 = vmul.f32 1.442695, %v1102_v31 }
0x14bf   :  { %v734_v34 = vpop.xlane.xlu0 %733 }
0x14c0   :  { %1308 = vpow2.f32 %v1103_v32 }
0x14c1   :  { %1310 = vlog2.f32 %v734_v34 }
0x14c2   :  { %1312 = vlog2.f32 %v548_v50 }
0x14c3   :  { %1314 = vlog2.f32 %v920_v38 }
0x14cd   :  { %v1309_v33 = vpop.eup %1308 }
0x14ce   :  { %1105 = vadd.xlane.f32.xlu0 %v1309_v33  ;;  %v1311_v43 = vpop.eup %1310 }
0x14cf   :  { %v1313_v44 = vpop.eup %1312  ;;  %v736_v15 = vmul.f32 0.6931472, %v1311_v43 }
0x14d0   :  { %v1315_v29 = vpop.eup %1314  ;;  %v550_v47 = vmul.f32 0.6931472, %v1313_v44 }
0x14d1   :  { %v737_v48 = vadd.f32 %v736_v15, %v1631_v56  ;;  %v922_v27 = vmul.f32 0.6931472, %v1315_v29 }
0x14d2   :  { %v551_v26 = vadd.f32 %v550_v47, %v1590_v21 }
0x14d3   :  { %v738_v28 = vsub.f32 %v1628_v55, %v737_v48  ;;  %v923_v11 = vadd.f32 %v922_v27, %v1672_v51 }
0x14d4   :  { %v552_v54 = vsub.f32 %v1587_v4, %v551_v26 }
0x14d5   :  { %v924_v59 = vsub.f32 %v1669_v49, %v923_v11 }
0x14d6   :  { %v1112_v58 = vsel %vm1111_vm15, %v552_v54, %v738_v28 }
0x14d7   :  { %v1114_v21 = vsel %vm1113_vm0, %v1112_v58, %v924_v59 }
0x1557   :  { %v1106_v40 = vpop.xlane.xlu0 %1105 }
0x1558   :  { %1316 = vlog2.f32 %v1106_v40 }
0x1565   :  { %v1317_v53 = vpop.eup %1316 }
0x1566   :  { %v1108_v57 = vmul.f32 0.6931472, %v1317_v53 }
0x1568   :  { %v1109_v52 = vadd.f32 %v1108_v57, %v1101_v45 }
0x156a   :  { %v1110_v56 = vsub.f32 %v1099_v30, %v1109_v52 }
0x156c   :  { %v1116_v62 = vsel %vm1115_vm1, %v1114_v21, %v1110_v56 }
0x156d   :  { %v1118_v55 = vsel %vm1117_vm2, %v1116_v62, 0.0 }
0x156e   :  { %1119 = vst [vmem:[#allocation8] sm:$0xff] %v1118_v55 }
0x156f   :  { %1389 = shalt.err (!%p1386_p5)
}
0x1570   :  { %1129 = dma.vmem_to_hbm [thread:$0]  %s1127_s29, 128, %s1723_s3, [#allocation4]  }
0x1571   :  { %1402 = dma.done.wait [#allocation4], 128  }
0x1572   :  { %1403 = vsyncadd [#allocation4], 4294967168 }
0x1573   :  { %1133 = vsyncpa [#allocation3], 1 }
0x1574   :  { %1134 = vsyncpa [#allocation6], 1 }
0x1575   :  { %1135 = vsyncpa [#allocation4], 1 }

</bundles_post_ra>
